<compile_context>
chip_gen: v7x
topology: tpu7x:2x2x1
jax: 0.10.0
libtpu: 0.0.40
codegen_flags: <defaults>
</compile_context>

<pallas_src>
import functools

import jax
import jax.numpy as jnp
from jax import lax
from jax.experimental import pallas as pl
from jax.experimental.pallas import tpu as pltpu


# ----------------------------- helpers -------------------------------------


def _round_up(x, m):
    return (x + m - 1) // m * m


def _cdiv(a, b):
    return (a + b - 1) // b


def _vmem_cap_bytes():
    """~75% of per-core VMEM (headroom for compiler scratch). v7x-safe fallback."""
    try:
        cap = int(pltpu.get_tpu_info().vmem_capacity_bytes)
    except Exception:
        cap = 64 * 2**20          # v7x per-TensorCore physical VMEM
    return cap * 3 // 4


def _max_tile_rows(onehot_cols, out_cols, n_feat, nn, comp_itemsize, table_bytes):
    """Largest row tile whose per-tile working set fits comfortably in VMEM."""
    avail = _vmem_cap_bytes() - 2 * table_bytes - (4 << 20)
    per_row = (2 * n_feat * 4 + 2 * max(nn, 0) * 4      # idx / numeric (dbl-buffered)
               + 4 * out_cols * 4                        # out dbl-buffer + result temps
               + 3 * onehot_cols * comp_itemsize)        # iota + one-hot temporaries
    per_row = max(per_row, 1)
    return max(8, (max(avail, 8 * per_row) // per_row) // 8 * 8)


def _vmem_budget(tile, onehot_cols, out_cols, n_feat, nn, comp_itemsize,
                 table_bytes_resident):
    est = (2 * tile * n_feat * 4
           + 2 * tile * max(nn, 0) * 4
           + table_bytes_resident
           + 4 * tile * out_cols * 4
           + 3 * tile * onehot_cols * comp_itemsize)
    return int(min(max(int(1.5 * est), 8 * 2**20), _vmem_cap_bytes()))


def _row_tiling(N, tile_n, tile_max):
    """Row tile + padded row count; prefers >=2 and even grid steps (v7x 2 TCs)."""
    tile = min(_round_up(tile_n, 8), _round_up(N, 8), tile_max)
    steps = _cdiv(N, tile)
    if steps < 2 and N > 8:
        steps = 2
    elif steps > 2 and steps % 2 == 1:
        steps += 1
    tile = max(8, _round_up(_cdiv(N, steps), 8))
    n_pad = steps * tile
    return tile, n_pad


# ----------------------------- kernels -------------------------------------


def _glove_cat_kernel(*refs, n_feat, emb_dim, vocab, n_num, out_pad,
                      comp_dtype, block_diag):
    """agg_type='cat' (optionally with numeric_separate features appended).

    Output tile is lane-padded to 128 and fully written via sub-stores; the
    HBM writeback DMA is one full-width lane-dense transfer per tile.
    """
    if n_num > 0:
        idx_ref, num_ref, emb_ref, out_ref = refs
    else:
        idx_ref, emb_ref, out_ref = refs
        num_ref = None

    tn = out_ref.shape[0]
    fd = n_feat * emb_dim

    if block_diag:
        # Stacked one-hot (tile, F*V) against the block-diagonal (F*V, F*D)
        # table: ONE MXU matmul emits the tile already in 'cat' lane layout.
        cols = n_feat * vocab
        iota = lax.broadcasted_iota(jnp.int32, (tn, cols), 1)
        onehot = jnp.zeros((tn, cols), comp_dtype)
        for f in range(n_feat):                                  # static unroll
            onehot = onehot + (
                (idx_ref[:, f:f + 1] + f * vocab) == iota).astype(comp_dtype)
        res = jnp.dot(onehot, emb_ref[...],
                      preferred_element_type=jnp.float32)        # (TN, F*D)
        out_ref[:, :fd] = res
    else:
        # Per-feature matmuls written straight into the output tile
        # (no F-way concatenate of narrow slabs).
        iota = lax.broadcasted_iota(jnp.int32, (tn, vocab), 1)
        emb = emb_ref[...]
        for f in range(n_feat):
            onehot = (idx_ref[:, f:f + 1] == iota).astype(comp_dtype)
            out_ref[:, f * emb_dim:(f + 1) * emb_dim] = jnp.dot(
                onehot, emb, preferred_element_type=jnp.float32)

    if n_num > 0:
        out_ref[:, fd:fd + n_num] = num_ref[...]
    if out_pad > 0:
        out_ref[:, fd + n_num:] = jnp.zeros((tn, out_pad), jnp.float32)


def _glove_agg_kernel(idx_ref, emb_ref, out_ref, *, n_feat, vocab, mean,
                      comp_dtype, out_pad):
    """agg_type='sum'/'mean': sum one-hots across features, ONE MXU matmul.

    The table stays at its natural (V, D) width; only the *result* is padded
    (in-register) so the store stays full-width lane-dense.
    """
    tn = out_ref.shape[0]
    d = emb_ref.shape[1]
    iota = lax.broadcasted_iota(jnp.int32, (tn, vocab), 1)

    acc = jnp.zeros((tn, vocab), comp_dtype)
    for f in range(n_feat):                                      # VPU compares only
        acc = acc + (idx_ref[:, f:f + 1] == iota).astype(comp_dtype)

    res = jnp.dot(acc, emb_ref[...], preferred_element_type=jnp.float32)
    if mean:
        res = res / float(n_feat)

    out_ref[:, :d] = res
    if out_pad > 0:
        out_ref[:, d:] = jnp.zeros((tn, out_pad), jnp.float32)


# ----------------------------- wrapper --------------------------------------


def trx_encoder_glove_forward(idx_btf, emb_table, seq_lens, numeric_btn=None,
                              agg_type='cat', numeric_separate=False,
                              tile_n=1024, compute_dtype=jnp.float32):
    """JAX/Pallas equivalent of TrxEncoderGlove.forward.

    idx_btf:     (B, T, F) int32  — categorical indices per glove feature
    emb_table:   (V, D)           — shared GloVe embedding weight
    numeric_btn: (B, T, NN) or None — numeric features (numeric_separate)
    compute_dtype: jnp.float32 or jnp.bfloat16 (table / one-hot dtype; the
        matmul always accumulates in f32).
    Returns (payload, seq_lens); payload is (B, T, out_dim) float32.
    """
    B, T, F = idx_btf.shape
    V, D = emb_table.shape
    N = B * T
    comp_itemsize = jnp.dtype(compute_dtype).itemsize

    idx_nf = idx_btf.reshape(N, F).astype(jnp.int32)
    emb = emb_table.astype(compute_dtype)

    if agg_type == 'cat':
        NN = 0
        num_nn = None
        if numeric_separate and numeric_btn is not None:
            NN = numeric_btn.shape[-1]
            num_nn = numeric_btn.reshape(N, NN).astype(jnp.float32)

        out_dim = F * D + NN
        out_dim_p = _round_up(out_dim, 128)          # lane-dense writeback

        # Block-diagonal single-matmul path for modest F*V; per-feature otherwise.
        block_diag = (F * V) * (F * D) * comp_itemsize <= (4 << 20)
        if block_diag:
            table = jnp.kron(jnp.eye(F, dtype=compute_dtype), emb)  # (F*V, F*D)
            onehot_cols = F * V
        else:
            table = emb
            onehot_cols = V
        table_bytes = int(table.size) * comp_itemsize

        tile_max = _max_tile_rows(onehot_cols, out_dim_p, F, NN,
                                  comp_itemsize, table_bytes)
        tile, n_pad = _row_tiling(N, tile_n, tile_max)

        if n_pad != N:
            # index 0 is a valid table row; padded rows are sliced off below.
            idx_nf = jnp.pad(idx_nf, ((0, n_pad - N), (0, 0)))
            if num_nn is not None:
                num_nn = jnp.pad(num_nn, ((0, n_pad - N), (0, 0)))

        kernel = functools.partial(
            _glove_cat_kernel, n_feat=F, emb_dim=D, vocab=V, n_num=NN,
            out_pad=out_dim_p - out_dim, comp_dtype=compute_dtype,
            block_diag=block_diag)

        def build_and_run(single_buffer_table):
            in_specs = [pl.BlockSpec((tile, F), lambda i: (i, 0))]
            inputs = [idx_nf]
            if NN > 0:
                in_specs.append(pl.BlockSpec((tile, NN), lambda i: (i, 0)))
                inputs.append(num_nn)
            if single_buffer_table:
                # Constant index_map: table is VMEM-resident; no 2nd buffer.
                in_specs.append(pl.BlockSpec(table.shape, lambda i: (0, 0),
                                             pipeline_mode=pl.Buffered(1)))
            else:
                in_specs.append(pl.BlockSpec(table.shape, lambda i: (0, 0)))
            inputs.append(table)
            call = pl.pallas_call(
                kernel,
                out_shape=jax.ShapeDtypeStruct((n_pad, out_dim_p), jnp.float32),
                grid_spec=pltpu.PrefetchScalarGridSpec(
                    num_scalar_prefetch=0,
                    grid=(n_pad // tile,),
                    in_specs=in_specs,
                    out_specs=pl.BlockSpec((tile, out_dim_p), lambda i: (i, 0)),
                ),
                compiler_params=pltpu.CompilerParams(
                    dimension_semantics=("parallel",),
                    vmem_limit_bytes=_vmem_budget(
                        tile, onehot_cols, out_dim_p, F, NN, comp_itemsize,
                        (1 if single_buffer_table else 2) * table_bytes),
                ),
            )
            return call(*inputs)

        try:
            out = build_and_run(True)
        except Exception:
            out = build_and_run(False)   # compiler rejected Buffered(1): fall back

        payload = out[:N, :out_dim].reshape(B, T, out_dim)
        return payload, seq_lens

    else:
        if numeric_separate:
            raise Exception('Only cat agg alowed with numeric separate')

        Dp = _round_up(D, 128)                       # pad RESULT, not the table
        table_bytes = V * D * comp_itemsize
        tile_max = _max_tile_rows(V, Dp, F, 0, comp_itemsize, table_bytes)
        tile, n_pad = _row_tiling(N, tile_n, tile_max)
        if n_pad != N:
            idx_nf = jnp.pad(idx_nf, ((0, n_pad - N), (0, 0)))

        kernel = functools.partial(_glove_agg_kernel, n_feat=F, vocab=V,
                                   mean=(agg_type != 'sum'),
                                   comp_dtype=compute_dtype, out_pad=Dp - D)

        def build_and_run(single_buffer_table):
            if single_buffer_table:
                table_spec = pl.BlockSpec((V, D), lambda i: (0, 0),
                                          pipeline_mode=pl.Buffered(1))
            else:
                table_spec = pl.BlockSpec((V, D), lambda i: (0, 0))
            call = pl.pallas_call(
                kernel,
                out_shape=jax.ShapeDtypeStruct((n_pad, Dp), jnp.float32),
                grid_spec=pltpu.PrefetchScalarGridSpec(
                    num_scalar_prefetch=0,
                    grid=(n_pad // tile,),
                    in_specs=[pl.BlockSpec((tile, F), lambda i: (i, 0)),
                              table_spec],
                    out_specs=pl.BlockSpec((tile, Dp), lambda i: (i, 0)),
                ),
                compiler_params=pltpu.CompilerParams(
                    dimension_semantics=("parallel",),
                    vmem_limit_bytes=_vmem_budget(
                        tile, V, Dp, F, 0, comp_itemsize,
                        (1 if single_buffer_table else 2) * table_bytes),
                ),
            )
            return call(idx_nf, emb)

        try:
            out = build_and_run(True)
        except Exception:
            out = build_and_run(False)

        payload = out[:N, :D].reshape(B, T, D)
        return payload, seq_lens


# ----------------------------- reference ------------------------------------


def _reference(idx_btf, emb_table, numeric_btn, agg_type, numeric_separate):
    F = idx_btf.shape[-1]
    looks = [emb_table[idx_btf[..., f]] for f in range(F)]   # each (B, T, D)
    if agg_type == 'cat':
        parts = list(looks)
        if numeric_separate and numeric_btn is not None:
            parts.append(numeric_btn)
        return jnp.concatenate(parts, axis=2)
    out = looks[0]
    for l in looks[1:]:
        out = out + l
    if agg_type == 'sum':
        return out
    return out / F


# ------------------------------- main ----------------------------------------


if __name__ == "__main__":
    key = jax.random.PRNGKey(0)

    # --- config 1: B*T is a multiple of the tile ---------------------------
    B, T = 4, 64         # batch, padded sequence length
    F = 3                # number of categorical (glove) features
    V, D = 64, 16        # glove vocab size, embedding dim
    NN = 2               # number of numeric features (numeric_separate)

    k_emb, k_idx, k_num = jax.random.split(key, 3)
    emb_table = jax.random.normal(k_emb, (V, D), dtype=jnp.float32)
    idx_btf = jax.random.randint(k_idx, (B, T, F), 0, V, dtype=jnp.int32)
    numeric_btn = jax.random.normal(k_num, (B, T, NN), dtype=jnp.float32)
    seq_lens = jnp.array([T, T - 3, T - 10, 5], dtype=jnp.int32)

    # agg_type='cat' with numeric_separate=True (f32 compute path)
    out_cat, lens_cat = trx_encoder_glove_forward(
        idx_btf, emb_table, seq_lens, numeric_btn=numeric_btn,
        agg_type='cat', numeric_separate=True)
    out_cat = jax.block_until_ready(out_cat)
    ref_cat = _reference(idx_btf, emb_table, numeric_btn, 'cat', True)
    assert out_cat.shape == (B, T, F * D + NN)
    assert jnp.allclose(out_cat, ref_cat, atol=1e-5, rtol=1e-5)
    assert jnp.array_equal(lens_cat, seq_lens)

    # agg_type='cat' with bf16 table/one-hot (v6e/v7x fast-path), loose tol
    out_bf16, _ = trx_encoder_glove_forward(
        idx_btf, emb_table, seq_lens, numeric_btn=numeric_btn,
        agg_type='cat', numeric_separate=True, compute_dtype=jnp.bfloat16)
    out_bf16 = jax.block_until_ready(out_bf16)
    assert jnp.allclose(out_bf16, ref_cat, atol=3e-2, rtol=3e-2)

    # agg_type='mean'
    out_mean, _ = trx_encoder_glove_forward(
        idx_btf, emb_table, seq_lens, agg_type='mean')
    out_mean = jax.block_until_ready(out_mean)
    ref_mean = _reference(idx_btf, emb_table, None, 'mean', False)
    assert out_mean.shape == (B, T, D)
    assert jnp.allclose(out_mean, ref_mean, atol=1e-5, rtol=1e-5)

    # agg_type='sum'
    out_sum, _ = trx_encoder_glove_forward(
        idx_btf, emb_table, seq_lens, agg_type='sum')
    out_sum = jax.block_until_ready(out_sum)
    ref_sum = _reference(idx_btf, emb_table, None, 'sum', False)
    assert jnp.allclose(out_sum, ref_sum, atol=1e-5, rtol=1e-5)

    # --- config 2: ragged B*T (exercises row padding / masking) ------------
    B2, T2 = 2, 9        # N = 18, not a multiple of 8 -> padded inside wrapper
    k_idx2, k_num2 = jax.random.split(k_idx)
    idx2 = jax.random.randint(k_idx2, (B2, T2, F), 0, V, dtype=jnp.int32)
    num2 = jax.random.normal(k_num2, (B2, T2, NN), dtype=jnp.float32)
    lens2 = jnp.array([T2, 4], dtype=jnp.int32)

    out2, _ = trx_encoder_glove_forward(
        idx2, emb_table, lens2, numeric_btn=num2,
        agg_type='cat', numeric_separate=True)
    out2 = jax.block_until_ready(out2)
    ref2 = _reference(idx2, emb_table, num2, 'cat', True)
    assert out2.shape == (B2, T2, F * D + NN)
    assert jnp.allclose(out2, ref2, atol=1e-5, rtol=1e-5)

    out2m, _ = trx_encoder_glove_forward(idx2, emb_table, lens2, agg_type='mean')
    out2m = jax.block_until_ready(out2m)
    ref2m = _reference(idx2, emb_table, None, 'mean', False)
    assert jnp.allclose(out2m, ref2m, atol=1e-5, rtol=1e-5)

    print("KERNEL_OK")
</pallas_src>

<mosaic_0001>
module attributes {stable_mosaic.version = 11 : i64} {
  func.func @_glove_cat_kernel(%arg0: i32, %arg1: memref<128x3xi32, #tpu.memory_space<vmem>>, %arg2: memref<128x2xf32, #tpu.memory_space<vmem>>, %arg3: memref<192x48xf32, #tpu.memory_space<vmem>>, %arg4: memref<128x128xf32, #tpu.memory_space<vmem>>) attributes {dimension_semantics = [#tpu.dimension_semantics<parallel>], iteration_bounds = array<i64: 2>, scalar_prefetch = 0 : i64, scratch_operands = 0 : i64, tpu.core_type = #tpu.core_type<tc>, window_params = [{transform_indices = @transform_0, window_bounds = array<i64: 128, 3>}, {transform_indices = @transform_1, window_bounds = array<i64: 128, 2>}, {pipeline_mode = #tpu.pipeline_mode<synchronous>, transform_indices = @transform_2, window_bounds = array<i64: 192, 48>}, {transform_indices = @transform_3, window_bounds = array<i64: 128, 128>}]} {
    %0 = tpu.iota {dimensions = array<i32: 1>} : vector<128x192xi32>
    %cst = arith.constant 0.000000e+00 : f32
    %1 = vector.broadcast %cst : f32 to vector<128x192xf32>
    %c0 = arith.constant 0 : index
    %c0_0 = arith.constant 0 : index
    %2 = vector.load %arg1[%c0, %c0_0] : memref<128x3xi32, #tpu.memory_space<vmem>>, vector<128x1xi32>
    %c0_i32 = arith.constant 0 : i32
    %3 = vector.broadcast %c0_i32 : i32 to vector<128x1xi32>
    %4 = arith.addi %2, %3 : vector<128x1xi32>
    %5 = vector.broadcast %4 : vector<128x1xi32> to vector<128x192xi32>
    %6 = arith.cmpi eq, %5, %0 : vector<128x192xi32>
    %7 = arith.extui %6 : vector<128x192xi1> to vector<128x192xi32>
    %8 = arith.sitofp %7 : vector<128x192xi32> to vector<128x192xf32>
    %9 = arith.addf %1, %8 : vector<128x192xf32>
    %c0_1 = arith.constant 0 : index
    %c1 = arith.constant 1 : index
    %10 = vector.load %arg1[%c0_1, %c1] : memref<128x3xi32, #tpu.memory_space<vmem>>, vector<128x1xi32>
    %c64_i32 = arith.constant 64 : i32
    %11 = vector.broadcast %c64_i32 : i32 to vector<128x1xi32>
    %12 = arith.addi %10, %11 : vector<128x1xi32>
    %13 = vector.broadcast %12 : vector<128x1xi32> to vector<128x192xi32>
    %14 = arith.cmpi eq, %13, %0 : vector<128x192xi32>
    %15 = arith.extui %14 : vector<128x192xi1> to vector<128x192xi32>
    %16 = arith.sitofp %15 : vector<128x192xi32> to vector<128x192xf32>
    %17 = arith.addf %9, %16 : vector<128x192xf32>
    %c0_2 = arith.constant 0 : index
    %c2 = arith.constant 2 : index
    %18 = vector.load %arg1[%c0_2, %c2] : memref<128x3xi32, #tpu.memory_space<vmem>>, vector<128x1xi32>
    %c128_i32 = arith.constant 128 : i32
    %19 = vector.broadcast %c128_i32 : i32 to vector<128x1xi32>
    %20 = arith.addi %18, %19 : vector<128x1xi32>
    %21 = vector.broadcast %20 : vector<128x1xi32> to vector<128x192xi32>
    %22 = arith.cmpi eq, %21, %0 : vector<128x192xi32>
    %23 = arith.extui %22 : vector<128x192xi1> to vector<128x192xi32>
    %24 = arith.sitofp %23 : vector<128x192xi32> to vector<128x192xf32>
    %25 = arith.addf %17, %24 : vector<128x192xf32>
    %c0_3 = arith.constant 0 : index
    %c0_4 = arith.constant 0 : index
    %26 = vector.load %arg3[%c0_3, %c0_4] : memref<192x48xf32, #tpu.memory_space<vmem>>, vector<192x48xf32>
    %cst_5 = arith.constant dense<0.000000e+00> : vector<128x48xf32>
    %27 = tpu.matmul %25, %26, %cst_5 {dimension_numbers = #tpu.dot_dimension_numbers<[1], [0], [0], [1], [0, 0, 1, 1], [], []>} : vector<128x192xf32>, vector<192x48xf32>, vector<128x48xf32> -> vector<128x48xf32>
    %c0_6 = arith.constant 0 : index
    %c0_7 = arith.constant 0 : index
    %28 = vector.load %arg4[%c0_6, %c0_7] : memref<128x128xf32, #tpu.memory_space<vmem>>, vector<128x48xf32>
    tpu.vector_store %arg4[%c0_6, %c0_7], %27 {strides = array<i32>} : memref<128x128xf32, #tpu.memory_space<vmem>>, vector<128x48xf32>,
    %c0_8 = arith.constant 0 : index
    %c0_9 = arith.constant 0 : index
    %29 = vector.load %arg2[%c0_8, %c0_9] : memref<128x2xf32, #tpu.memory_space<vmem>>, vector<128x2xf32>
    %c0_10 = arith.constant 0 : index
    %c48 = arith.constant 48 : index
    %30 = vector.load %arg4[%c0_10, %c48] : memref<128x128xf32, #tpu.memory_space<vmem>>, vector<128x2xf32>
    tpu.vector_store %arg4[%c0_10, %c48], %29 {strides = array<i32>} : memref<128x128xf32, #tpu.memory_space<vmem>>, vector<128x2xf32>,
    %cst_11 = arith.constant 0.000000e+00 : f32
    %31 = vector.broadcast %cst_11 : f32 to vector<128x78xf32>
    %c0_12 = arith.constant 0 : index
    %c50 = arith.constant 50 : index
    %32 = vector.load %arg4[%c0_12, %c50] : memref<128x128xf32, #tpu.memory_space<vmem>>, vector<128x78xf32>
    tpu.vector_store %arg4[%c0_12, %c50], %31 {strides = array<i32>} : memref<128x128xf32, #tpu.memory_space<vmem>>, vector<128x78xf32>,
    return
  }
  func.func @transform_0(%arg0: i32) -> (i32, i32) {
    %c0_i32 = arith.constant 0 : i32
    %c0_i32_0 = arith.constant 0 : i32
    return %arg0, %c0_i32 : i32, i32
  }
  func.func @transform_1(%arg0: i32) -> (i32, i32) {
    %c0_i32 = arith.constant 0 : i32
    %c0_i32_0 = arith.constant 0 : i32
    return %arg0, %c0_i32 : i32, i32
  }
  func.func @transform_2(%arg0: i32) -> (i32, i32) {
    %c0_i32 = arith.constant 0 : i32
    %c0_i32_0 = arith.constant 0 : i32
    %c0_i32_1 = arith.constant 0 : i32
    return %c0_i32, %c0_i32_0 : i32, i32
  }
  func.func @transform_3(%arg0: i32) -> (i32, i32) {
    %c0_i32 = arith.constant 0 : i32
    %c0_i32_0 = arith.constant 0 : i32
    return %arg0, %c0_i32 : i32, i32
  }
}

module attributes {stable_mosaic.version = 11 : i64} {
  func.func @_glove_cat_kernel(%arg0: i32, %arg1: memref<128x3xi32, #tpu.memory_space<vmem>>, %arg2: memref<128x2xf32, #tpu.memory_space<vmem>>, %arg3: memref<192x48xf32, #tpu.memory_space<vmem>>, %arg4: memref<128x128xf32, #tpu.memory_space<vmem>>) attributes {dimension_semantics = [#tpu.dimension_semantics<parallel>], iteration_bounds = array<i64: 2>, scalar_prefetch = 0 : i64, scratch_operands = 0 : i64, tpu.core_type = #tpu.core_type<tc>, window_params = [{transform_indices = @transform_0, window_bounds = array<i64: 128, 3>}, {transform_indices = @transform_1, window_bounds = array<i64: 128, 2>}, {pipeline_mode = #tpu.pipeline_mode<synchronous>, transform_indices = @transform_2, window_bounds = array<i64: 192, 48>}, {transform_indices = @transform_3, window_bounds = array<i64: 128, 128>}]} {
    %0 = tpu.iota {dimensions = array<i32: 1>} : vector<128x192xi32>
    %cst = arith.constant 0.000000e+00 : f32
    %1 = vector.broadcast %cst : f32 to vector<128x192xf32>
    %c0 = arith.constant 0 : index
    %c0_0 = arith.constant 0 : index
    %2 = vector.load %arg1[%c0, %c0_0] : memref<128x3xi32, #tpu.memory_space<vmem>>, vector<128x1xi32>
    %c0_i32 = arith.constant 0 : i32
    %3 = vector.broadcast %c0_i32 : i32 to vector<128x1xi32>
    %4 = arith.addi %2, %3 : vector<128x1xi32>
    %5 = vector.broadcast %4 : vector<128x1xi32> to vector<128x192xi32>
    %6 = arith.cmpi eq, %5, %0 : vector<128x192xi32>
    %7 = arith.extui %6 : vector<128x192xi1> to vector<128x192xi32>
    %8 = arith.sitofp %7 : vector<128x192xi32> to vector<128x192xf32>
    %9 = arith.addf %1, %8 : vector<128x192xf32>
    %c0_1 = arith.constant 0 : index
    %c1 = arith.constant 1 : index
    %10 = vector.load %arg1[%c0_1, %c1] : memref<128x3xi32, #tpu.memory_space<vmem>>, vector<128x1xi32>
    %c64_i32 = arith.constant 64 : i32
    %11 = vector.broadcast %c64_i32 : i32 to vector<128x1xi32>
    %12 = arith.addi %10, %11 : vector<128x1xi32>
    %13 = vector.broadcast %12 : vector<128x1xi32> to vector<128x192xi32>
    %14 = arith.cmpi eq, %13, %0 : vector<128x192xi32>
    %15 = arith.extui %14 : vector<128x192xi1> to vector<128x192xi32>
    %16 = arith.sitofp %15 : vector<128x192xi32> to vector<128x192xf32>
    %17 = arith.addf %9, %16 : vector<128x192xf32>
    %c0_2 = arith.constant 0 : index
    %c2 = arith.constant 2 : index
    %18 = vector.load %arg1[%c0_2, %c2] : memref<128x3xi32, #tpu.memory_space<vmem>>, vector<128x1xi32>
    %c128_i32 = arith.constant 128 : i32
    %19 = vector.broadcast %c128_i32 : i32 to vector<128x1xi32>
    %20 = arith.addi %18, %19 : vector<128x1xi32>
    %21 = vector.broadcast %20 : vector<128x1xi32> to vector<128x192xi32>
    %22 = arith.cmpi eq, %21, %0 : vector<128x192xi32>
    %23 = arith.extui %22 : vector<128x192xi1> to vector<128x192xi32>
    %24 = arith.sitofp %23 : vector<128x192xi32> to vector<128x192xf32>
    %25 = arith.addf %17, %24 : vector<128x192xf32>
    %c0_3 = arith.constant 0 : index
    %c0_4 = arith.constant 0 : index
    %26 = vector.load %arg3[%c0_3, %c0_4] : memref<192x48xf32, #tpu.memory_space<vmem>>, vector<192x48xf32>
    %cst_5 = arith.constant dense<0.000000e+00> : vector<128x48xf32>
    %27 = tpu.matmul %25, %26, %cst_5 {dimension_numbers = #tpu.dot_dimension_numbers<[1], [0], [0], [1], [0, 0, 1, 1], [], []>} : vector<128x192xf32>, vector<192x48xf32>, vector<128x48xf32> -> vector<128x48xf32>
    %c0_6 = arith.constant 0 : index
    %c0_7 = arith.constant 0 : index
    %28 = vector.load %arg4[%c0_6, %c0_7] : memref<128x128xf32, #tpu.memory_space<vmem>>, vector<128x48xf32>
    tpu.vector_store %arg4[%c0_6, %c0_7], %27 {strides = array<i32>} : memref<128x128xf32, #tpu.memory_space<vmem>>, vector<128x48xf32>,
    %c0_8 = arith.constant 0 : index
    %c0_9 = arith.constant 0 : index
    %29 = vector.load %arg2[%c0_8, %c0_9] : memref<128x2xf32, #tpu.memory_space<vmem>>, vector<128x2xf32>
    %c0_10 = arith.constant 0 : index
    %c48 = arith.constant 48 : index
    %30 = vector.load %arg4[%c0_10, %c48] : memref<128x128xf32, #tpu.memory_space<vmem>>, vector<128x2xf32>
    tpu.vector_store %arg4[%c0_10, %c48], %29 {strides = array<i32>} : memref<128x128xf32, #tpu.memory_space<vmem>>, vector<128x2xf32>,
    %cst_11 = arith.constant 0.000000e+00 : f32
    %31 = vector.broadcast %cst_11 : f32 to vector<128x78xf32>
    %c0_12 = arith.constant 0 : index
    %c50 = arith.constant 50 : index
    %32 = vector.load %arg4[%c0_12, %c50] : memref<128x128xf32, #tpu.memory_space<vmem>>, vector<128x78xf32>
    tpu.vector_store %arg4[%c0_12, %c50], %31 {strides = array<i32>} : memref<128x128xf32, #tpu.memory_space<vmem>>, vector<128x78xf32>,
    return
  }
  func.func @transform_0(%arg0: i32) -> (i32, i32) {
    %c0_i32 = arith.constant 0 : i32
    %c0_i32_0 = arith.constant 0 : i32
    return %arg0, %c0_i32 : i32, i32
  }
  func.func @transform_1(%arg0: i32) -> (i32, i32) {
    %c0_i32 = arith.constant 0 : i32
    %c0_i32_0 = arith.constant 0 : i32
    return %arg0, %c0_i32 : i32, i32
  }
  func.func @transform_2(%arg0: i32) -> (i32, i32) {
    %c0_i32 = arith.constant 0 : i32
    %c0_i32_0 = arith.constant 0 : i32
    %c0_i32_1 = arith.constant 0 : i32
    return %c0_i32, %c0_i32_0 : i32, i32
  }
  func.func @transform_3(%arg0: i32) -> (i32, i32) {
    %c0_i32 = arith.constant 0 : i32
    %c0_i32_0 = arith.constant 0 : i32
    return %arg0, %c0_i32 : i32, i32
  }
}

</mosaic_0001>

<bundles_post_ra>
// kernel: tpu_custom_call.1
= control target key start
LH: loop header
LB: loop body
LE: loop exit
PB: predicated region body
PF: predicated region fallthrough
CT: control target
= control target key end

     0   :  { %8 = vsyncpa [#allocation3], 0  ;;  %s2282_s0 = inlined_call_operand.vmem [shape: s32[256,3], index: 0, kind: input, shape index: {}]   ;;  %s2283_s1 = inlined_call_operand.vmem [shape: f32[256,2], index: 1, kind: input, shape index: {}]   ;;  %s2284_s2 = inlined_call_operand.vmem [shape: f32[192,48], index: 2, kind: input, shape index: {}]   ;;  %s2285_s3 = inlined_call_operand.hbm [shape: f32[256,128], index: 3, kind: output, shape index: {}]  }
   0x1   :  { %10 = vsyncpa [#allocation3 + $0x1], 0  ;;  %s1562_s12 = smov 0   ;;  %s1564_s13 = smov 0  }
   0x2   :  { %s1566_s14 = smov 0   ;;  %s1568_s15 = smov 0  }
   0x3 LB: > { %s1583_s16 = sadd.s32 4294967295, %s1531_s15   ;;  %s1210_s17 = sadd.s32 4294967294, %s1531_s15   ;;  %s1531_s15 = sphi %s1568_s15, %s2291_s15   ;;  %s1527_s14 = sphi %s1566_s14, %s2290_s14   ;;  %s1523_s13 = sphi %s1564_s13, %s2289_s13   ;;  %s1519_s12 = sphi %s1562_s12, %s2288_s12  }
   0x4   : > { %s1587_s18 = sadd.s32 1, %s1531_s15   ;;  %s96_s19 = sadd.s32 1, %s1527_s14 }
   0x5   : > { %s93_s20 = ssub.s32 %s1531_s15, %s1587_s18  ;;  %p106_p0 = scmp.ne.s32.totalorder %s1527_s14, %s1523_s13 }
   0x6   : > { %p94_p1 = scmp.eq.s32.totalorder %s93_s20, 0  ;;  %p107_p2 = scmp.eq.s32.totalorder %s1583_s16, 1 }
   0x7   : > { %p112_p3 = scmp.ne.s32.totalorder %s1523_s13, %s1519_s12  ;;  %p113_p4 = scmp.eq.s32.totalorder %s1210_s17, 1 }
   0x8   : > { %s1598_s21 = scalar_select %p94_p1, %s1527_s14, %s96_s19  }
   0x9   : > { %p1600_p5 = por %p107_p2, %p106_p0  ;;  %p1604_p6 = por %p113_p4, %p112_p3 }
   0xa   : > { %p1213_p7 = scmp.ge.s32.totalorder %s1531_s15, 1  ;;  %p152_p8 = scmp.lt.s32.totalorder %s1531_s15, 3 }
   0xc   : > { %p153_p9 = pnand %p1213_p7, %p152_p8 }
   0xd   : > { %s1215_s24 = sshll.u32 (!%p153_p9), %s1583_s16, 4  ;;  %v773_v0 = vld [vmem:[%s2284_s2] sm:$0xff] (!%p153_p9)  ;;  %v1533_v1 = vmov (!%p153_p9), 0   ;;  %v1534_v2 = vmov (!%p153_p9), 1   ;;  %v774_v3 = vld [vmem:[%s2284_s2 + $0x8] sm:$0xff] (!%p153_p9)  ;;  %v775_v4 = vld [vmem:[%s2284_s2 + $0x10] sm:$0xff] (!%p153_p9) }
   0xe   : > { %156 = sbr.rel (%p153_p9) target bundleno = 531 (0x213), region = 32  ;;  %1444 = vset.pattern.permute.xlu0 (!%p153_p9), %v1533_v1  ;;  %p182_p10 = scmp.lt.s32.totalorder (!%p153_p9), %s1215_s24, 31  ;;  %1445 = vset.pattern.permute.xlu1 (!%p153_p9), %v1534_v2  ;;  %v776_v5 = vld [vmem:[%s2284_s2 + $0x18] sm:$0xff] (!%p153_p9)  ;;  %v1535_v6 = vmov (!%p153_p9), 0.0|0.0   ;;  %v1338_v7 = vpack.c.bf16 (!%p153_p9), %v774_v3, %v773_v0  ;;  %v777_v9 = vld [vmem:[%s2284_s2 + $0x20] sm:$0xff] (!%p153_p9)  ;;  %v778_v10 = vld [vmem:[%s2284_s2 + $0x28] sm:$0xff] (!%p153_p9) }
   0xf   : > { %1373 = vmatprep.subr.bf16.mxu1 (!%p153_p9), %v1535_v6  ;;  %1337 = vmatprep.subr.bf16.mxu0 (!%p153_p9), %v1535_v6  ;;  %v1341_v8 = vpack.c.bf16 (!%p153_p9), %v776_v5, %v775_v4  ;;  %v1344_v14 = vpack.c.bf16 (!%p153_p9), %v778_v10, %v777_v9  ;;  %v779_v15 = vld [vmem:[%s2284_s2 + $0x30] sm:$0xff] (!%p153_p9)  ;;  %v780_v16 = vld [vmem:[%s2284_s2 + $0x38] sm:$0xff] (!%p153_p9)  ;;  %v781_v20 = vld [vmem:[%s2284_s2 + $0x40] sm:$0xff] (!%p153_p9)  ;;  %v1536_v25 = vmov (!%p153_p9), 2   ;;  %vm797_vm6 = vcmask (!%p153_p9), 523264   ;;  %s1538_s5 = smov (!%p153_p9), 48  }
  0x10   : > { %1385 = vmatpush1.bf16.msra.mxu1 (!%p153_p9), %v1338_v7  ;;  %1339 = vmatpush1.bf16.msra.mxu0 (!%p153_p9), %v1338_v7  ;;  %v1347_v18 = vpack.c.bf16 (!%p153_p9), %v780_v16, %v779_v15  ;;  %v782_v21 = vld [vmem:[%s2284_s2 + $0x48] sm:$0xff] (!%p153_p9)  ;;  %v783_v26 = vld [vmem:[%s2284_s2 + $0x50] sm:$0xff] (!%p153_p9)  ;;  %v784_v27 = vld [vmem:[%s2284_s2 + $0x58] sm:$0xff] (!%p153_p9)  ;;  %s1336_s8 = sshll.u32 (!%p153_p9), %s1583_s16, 11  ;;  %s1539_s25 = smov (!%p153_p9), [#allocation2]  }
  0x11   : > { %1374 = vmatprep.subr.bf16.mxu1 (!%p153_p9), %v1535_v6  ;;  %1340 = vmatprep.subr.bf16.mxu0 (!%p153_p9), %v1535_v6  ;;  %v1350_v23 = vpack.c.bf16 (!%p153_p9), %v782_v21, %v781_v20  ;;  %v1353_v30 = vpack.c.bf16 (!%p153_p9), %v784_v27, %v783_v26  ;;  %v785_v31 = vld [vmem:[%s2284_s2 + $0x60] sm:$0xff] (!%p153_p9)  ;;  %v786_v32 = vld [vmem:[%s2284_s2 + $0x68] sm:$0xff] (!%p153_p9)  ;;  %v787_v36 = vld [vmem:[%s2284_s2 + $0x70] sm:$0xff] (!%p153_p9)  ;;  %s2228_s17 = scalar_lea.hbm (!%p153_p9), %s2285_s3, %s1336_s8  ;;  %s1473_s26 = sshll.u32 (!%p153_p9), %s1539_s25, 4  ;;  %s1474_s26 = int_to_ptr.vmem [resolvable:$false] %s1473_s26 }
  0x12   : > { %v1356_v35 = vpack.c.bf16 (!%p153_p9), %v786_v32, %v785_v31  ;;  %v788_v37 = vld [vmem:[%s2284_s2 + $0x78] sm:$0xff] (!%p153_p9)  ;;  %v789_v41 = vld [vmem:[%s2284_s2 + $0x80] sm:$0xff] (!%p153_p9)  ;;  %v790_v42 = vld [vmem:[%s2284_s2 + $0x88] sm:$0xff] (!%p153_p9)  ;;  %s1475_s27 = scalar_lea.vmem (!%p153_p9), %s1474_s26, 4096 }
  0x13   : > { %v1359_v40 = vpack.c.bf16 (!%p153_p9), %v788_v37, %v787_v36  ;;  %v1362_v44 = vpack.c.bf16 (!%p153_p9), %v790_v42, %v789_v41  ;;  %v791_v46 = vld [vmem:[%s2284_s2 + $0x90] sm:$0xff] (!%p153_p9)  ;;  %v792_v47 = vld [vmem:[%s2284_s2 + $0x98] sm:$0xff] (!%p153_p9)  ;;  %v793_v50 = vld [vmem:[%s2284_s2 + $0xa0] sm:$0xff] (!%p153_p9) }
  0x14   : > { %1386 = vmatpush1.bf16.msra.mxu1 (!%p153_p9), %v1341_v8  ;;  %1342 = vmatpush1.bf16.msra.mxu0 (!%p153_p9), %v1341_v8  ;;  %v1365_v49 = vpack.c.bf16 (!%p153_p9), %v792_v47, %v791_v46  ;;  %v794_v51 = vld [vmem:[%s2284_s2 + $0xa8] sm:$0xff] (!%p153_p9)  ;;  %v795_v55 = vld [vmem:[%s2284_s2 + $0xb0] sm:$0xff] (!%p153_p9)  ;;  %v796_v56 = vld [vmem:[%s2284_s2 + $0xb8] sm:$0xff] (!%p153_p9) }
  0x15   : > { %s2293_s24 = smov (!%p182_p10, %s1215_s24), 31  ;;  %1375 = vmatprep.subr.bf16.mxu1 %v1535_v6  ;;  %1343 = vmatprep.subr.bf16.mxu0 %v1535_v6  ;;  %v1368_v54 = vpack.c.bf16 %v794_v51, %v793_v50  ;;  %v1371_v59 = vpack.c.bf16 %v796_v56, %v795_v55 }
  0x16   : > { %s1216_s6 = sshll.u32 %s2293_s24, 3  ;;  %s178_s24 = sand.u32 1, %s1523_s13  }
  0x17   : > { %s1643_s19 = scalar_lea.vmem %s2282_s0, %s1216_s6  ;;  %s1833_s4 = scalar_lea.vmem %s2283_s1, %s1216_s6 }
  0x18   : > { %v1646_v11 = vld [vmem:[%s1643_s19] sm:$0xff]  ;;  %1387 = vmatpush1.bf16.msra.mxu1 %v1344_v14  ;;  %v206_v19 = vld [vmem:[%s1643_s19 + $0x48] sm:$0xff]  ;;  %1345 = vmatpush1.bf16.msra.mxu0 %v1344_v14  ;;  %v1669_v24 = vld [vmem:[%s1643_s19 + $0x50] sm:$0xff]  ;;  %s1214_s6 = sshll.u32 %s178_s24, 7  ;;  %s2241_s16 = scalar_lea.sflag [#allocation3], %s178_s24 }
  0x19   : > { %v205_v12 = vld [vmem:[%s1643_s19 + $0x40] sm:$0xff]  ;;  %214 = vperm.xlu0 %1444, %v1646_v11   ;;  %v389_v13 = vadd.s32 64, %v1646_v11  ;;  %1376 = vmatprep.subr.bf16.mxu1 %v1535_v6  ;;  %v1682_v28 = vld [vmem:[%s1643_s19 + $0x58] sm:$0xff]  ;;  %v1685_v29 = vld [vmem:[%s1643_s19 + $0x8] sm:$0xff]  ;;  %v398_v39 = vadd.s32 64, %v206_v19  ;;  %v590_v45 = vadd.s32 128, %v206_v19 }
  0x1a   : > { %v397_v17 = vadd.s32 64, %v205_v12  ;;  %1346 = vmatprep.subr.bf16.mxu0 %v1535_v6  ;;  %v589_v22 = vadd.s32 128, %v205_v12  ;;  %v1699_v33 = vld [vmem:[%s1643_s19 + $0x60] sm:$0xff]  ;;  %v390_v34 = vadd.s32 64, %v1685_v29  ;;  %v1713_v38 = vld [vmem:[%s1643_s19 + $0x68] sm:$0xff]  ;;  %v1725_v43 = vld [vmem:[%s1643_s19 + $0x70] sm:$0xff] }
  0x1b   : > { %406 = vperm.xlu1 %1445, %v389_v13   ;;  %v1738_v48 = vld [vmem:[%s1643_s19 + $0x78] sm:$0xff]  ;;  %v199_v52 = vld [vmem:[%s1643_s19 + $0x10] sm:$0xff]  ;;  %v581_v53 = vadd.s32 128, %v1646_v11  ;;  %v582_v58 = vadd.s32 128, %v1685_v29  ;;  %v399_v60 = vadd.s32 64, %v1669_v24  ;;  %v591_v63 = vadd.s32 128, %v1669_v24 }
  0x1c   : > { %1388 = vmatpush1.bf16.msra.mxu1 %v1347_v18  ;;  %1348 = vmatpush1.bf16.msra.mxu0 %v1347_v18  ;;  %v391_v57 = vadd.s32 64, %v199_v52  ;;  %v583_v61 = vadd.s32 128, %v199_v52  ;;  %v200_v62 = vld [vmem:[%s1643_s19 + $0x18] sm:$0xff]  ;;  %v201_v3 = vld [vmem:[%s1643_s19 + $0x20] sm:$0xff]  ;;  %v202_v5 = vld [vmem:[%s1643_s19 + $0x28] sm:$0xff]  ;;  %v400_v11 = vadd.s32 64, %v1682_v28 }
  0x1d   : > { %238 = vperm.xlu0 %1444, %v205_v12   ;;  %1377 = vmatprep.subr.bf16.mxu1 %v1535_v6  ;;  %v584_v0 = vadd.s32 128, %v200_v62  ;;  %v585_v4 = vadd.s32 128, %v201_v3  ;;  %v203_v7 = vld [vmem:[%s1643_s19 + $0x30] sm:$0xff]  ;;  %v392_v8 = vadd.s32 64, %v200_v62  ;;  %v204_v10 = vld [vmem:[%s1643_s19 + $0x38] sm:$0xff]  ;;  %v592_v13 = vadd.s32 128, %v1682_v28 }
  0x1e   : > { %1349 = vmatprep.subr.bf16.mxu0 %v1535_v6  ;;  %v587_v9 = vadd.s32 128, %v203_v7  ;;  %v588_v12 = vadd.s32 128, %v204_v10  ;;  %v393_v14 = vadd.s32 64, %v201_v3  ;;  %v401_v15 = vadd.s32 64, %v1699_v33  ;;  %s2112_s7 = scalar_lea.vmem [#allocation2], %s1214_s6 }
  0x1f   : > { %430 = vperm.xlu1 %1445, %v397_v17   ;;  %v593_v16 = vadd.s32 128, %v1699_v33  ;;  %v394_v17 = vadd.s32 64, %v202_v5  ;;  %v402_v18 = vadd.s32 64, %v1713_v38  ;;  %v395_v20 = vadd.s32 64, %v203_v7  ;;  %s1136_s9 = sshll.u32 %s2112_s7, 4  ;;  %s2230_s9 = int_to_ptr.vmem [resolvable:$true] %s1136_s9 }
  0x20   : > { %1389 = vmatpush1.bf16.msra.mxu1 %v1350_v23  ;;  %1351 = vmatpush1.bf16.msra.mxu0 %v1350_v23  ;;  %v403_v21 = vadd.s32 64, %v1725_v43  ;;  %v194_v23 = vlaneseq  ;;  %v404_v32 = vadd.s32 64, %v1738_v48  ;;  %s1469_s20 = scalar_lea.vmem %s2230_s9, 2048  ;;  %p1476_p0 = scmp.lt.s32.totalorder %s2230_s9, %s1474_s26 }
  0x21   : > { %241 = vperm.xlu0 %1444, %v206_v19   ;;  %1378 = vmatprep.subr.bf16.mxu1 %v1535_v6  ;;  %v594_v19 = vadd.s32 128, %v1713_v38  ;;  %p1470_p11 = scmp.ne.s32.totalorder %s2230_s9, %s1469_s20  ;;  %p1477_p1 = scmp.lt.s32.totalorder %s1475_s27, %s1469_s20 }
  0x22   : > { %1352 = vmatprep.subr.bf16.mxu0 %v1535_v6 }
  0x23   : > { %1446 = vset.pattern.permute.xlu1 %v1536_v25  ;;  %p1471_p12 = pnand %p1470_p11, %p1600_p5  ;;  %p1478_p2 = por %p1477_p1, %p1476_p0 }
  0x24   : > { %622 = vperm.xlu1 %1446, %v589_v22   ;;  %1390 = vmatpush1.bf16.msra.mxu1 %v1353_v30  ;;  %v595_v22 = vadd.s32 128, %v1725_v43 }
  0x25   : > { %244 = vperm.xlu0 %1444, %v1669_v24   ;;  %1354 = vmatpush1.bf16.msra.mxu0 %v1353_v30  ;;  %v1793_v24 = vand.u32 127, %v194_v23  ;;  %v396_v30 = vadd.s32 64, %v204_v10  ;;  %p1472_p13 = pneg %p1471_p12 }
  0x26   : > { %1379 = vmatprep.subr.bf16.mxu1 %v1535_v6  ;;  %1355 = vmatprep.subr.bf16.mxu0 %v1535_v6 }
  0x27   : > { %p1479_p3 = pnand %p1478_p2, %p1472_p13 }
  0x28   : > { %1447 = vset.pattern.permute.xlu1 %v1533_v1  ;;  %1391 = vmatpush1.bf16.msra.mxu1 %v1356_v35 }
  0x29   : > { %247 = vperm.xlu0 %1444, %v1682_v28   ;;  %217 = vperm.xlu1 %1447, %v1685_v29   ;;  %v1801_v28 = vadd.s32 128, %v1793_v24 }
  0x2a   : > { %1380 = vmatprep.subr.bf16.mxu1 %v1535_v6  ;;  %1357 = vmatpush1.bf16.msra.mxu0 %v1356_v35 }
  0x2b   : > { %1358 = vmatprep.subr.bf16.mxu0 %v1535_v6 }
  0x2c   : > { %1392 = vmatpush1.bf16.msra.mxu1 %v1359_v40 }
  0x2d   : > { %250 = vperm.xlu0 %1444, %v1699_v33   ;;  %1448 = vset.pattern.permute.xlu1 %v1534_v2  ;;  %v1537_v33 = vmov 0.0  }
  0x2e   : > { %409 = vperm.xlu1 %1448, %v390_v34   ;;  %1381 = vmatprep.subr.bf16.mxu1 %v1535_v6 }
  0x2f   : > { %1360 = vmatpush1.bf16.msra.mxu0 %v1359_v40 }
  0x30   : > { %1361 = vmatprep.subr.bf16.mxu0 %v1535_v6  ;;  %1393 = vmatpush1.bf16.msra.mxu1 %v1362_v44 }
  0x31   : > { %253 = vperm.xlu0 %1444, %v1713_v38   ;;  %1382 = vmatprep.subr.bf16.mxu1 %v1535_v6 }
  0x32   : > { %433 = vperm.xlu1 %1448, %v398_v39  }
  0x33   : > { %1363 = vmatpush1.bf16.msra.mxu0 %v1362_v44 }
  0x34   : > { %1364 = vmatprep.subr.bf16.mxu0 %v1535_v6  ;;  %1394 = vmatpush1.bf16.msra.mxu1 %v1365_v49 }
  0x35   : > { %256 = vperm.xlu0 %1444, %v1725_v43   ;;  %1383 = vmatprep.subr.bf16.mxu1 %v1535_v6  ;;  %v596_v43 = vadd.s32 128, %v1738_v48 }
  0x36   : > { %1449 = vset.pattern.permute.xlu1 %v1536_v25 }
  0x37   : > { %625 = vperm.xlu1 %1449, %v590_v45   ;;  %1366 = vmatpush1.bf16.msra.mxu0 %v1365_v49 }
  0x38   : > { %1367 = vmatprep.subr.bf16.mxu0 %v1535_v6  ;;  %1395 = vmatpush1.bf16.msra.mxu1 %v1368_v54 }
  0x39   : > { %259 = vperm.xlu0 %1444, %v1738_v48   ;;  %1384 = vmatprep.subr.bf16.mxu1 %v1535_v6  ;;  %v1008_v48 = vld [vmem:[%s1833_s4] sm:$0xff] }
  0x3b   : > { %1450 = vset.pattern.permute.xlu1 %v1533_v1  ;;  %1369 = vmatpush1.bf16.msra.mxu0 %v1368_v54  ;;  %v1010_v54 = vld [vmem:[%s1833_s4 + $0x10] sm:$0xff] }
  0x3c   : > { %220 = vperm.xlu1 %1450, %v199_v52   ;;  %1370 = vmatprep.subr.bf16.mxu0 %v1535_v6  ;;  %v586_v6 = vadd.s32 128, %v202_v5 }
  0x3d   : > { %1466 = vset.pattern.permute.xlu0 %v1536_v25  ;;  %1396 = vmatpush1.bf16.msra.mxu1 %v1371_v59 }
  0x3e   : > { %598 = vperm.xlu0 %1466, %v581_v53   ;;  %v1011_v53 = vld [vmem:[%s1833_s4 + $0x18] sm:$0xff] }
  0x3f   : > { %1372 = vmatpush1.bf16.msra.mxu0 %v1371_v59 }
  0x40   : > { %1451 = vset.pattern.permute.xlu1 %v1534_v2 }
  0x41   : > { %412 = vperm.xlu1 %1451, %v391_v57  }
  0x42   : > { %601 = vperm.xlu0 %1466, %v582_v58  }
  0x45   : > { %436 = vperm.xlu1 %1451, %v399_v60   ;;  %v1013_v60 = vld [vmem:[%s1833_s4 + $0x28] sm:$0xff] }
  0x46   : > { %604 = vperm.xlu0 %1466, %v583_v61   ;;  %v1012_v61 = vld [vmem:[%s1833_s4 + $0x20] sm:$0xff] }
  0x49   : > { %1452 = vset.pattern.permute.xlu1 %v1536_v25 }
  0x4a   : > { %628 = vperm.xlu1 %1452, %v591_v63   ;;  %607 = vperm.xlu0 %1466, %v584_v0  }
  0x4e   : > { %1453 = vset.pattern.permute.xlu1 %v1533_v1  ;;  %610 = vperm.xlu0 %1466, %v585_v4  }
  0x4f   : > { %223 = vperm.xlu1 %1453, %v200_v62  }
  0x52   : > { %613 = vperm.xlu0 %1466, %v586_v6  }
  0x53   : > { %1454 = vset.pattern.permute.xlu1 %v1534_v2 }
  0x54   : > { %415 = vperm.xlu1 %1454, %v392_v8  }
  0x56   : > { %616 = vperm.xlu0 %1466, %v587_v9  }
  0x58   : > { %439 = vperm.xlu1 %1454, %v400_v11  }
  0x5a   : > { %619 = vperm.xlu0 %1466, %v588_v12  }
  0x5c   : > { %1455 = vset.pattern.permute.xlu1 %v1536_v25 }
  0x5d   : > { %631 = vperm.xlu1 %1455, %v592_v13  }
  0x61   : > { %1456 = vset.pattern.permute.xlu1 %v1533_v1 }
  0x62   : > { %226 = vperm.xlu1 %1456, %v201_v3  }
  0x66   : > { %1457 = vset.pattern.permute.xlu1 %v1534_v2 }
  0x67   : > { %418 = vperm.xlu1 %1457, %v393_v14  }
  0x6b   : > { %442 = vperm.xlu1 %1457, %v401_v15  }
  0x6f   : > { %1458 = vset.pattern.permute.xlu1 %v1536_v25 }
  0x70   : > { %634 = vperm.xlu1 %1458, %v593_v16  }
  0x74   : > { %1459 = vset.pattern.permute.xlu1 %v1533_v1 }
  0x75   : > { %229 = vperm.xlu1 %1459, %v202_v5  }
  0x79   : > { %1460 = vset.pattern.permute.xlu1 %v1534_v2 }
  0x7a   : > { %421 = vperm.xlu1 %1460, %v394_v17  }
  0x7e   : > { %445 = vperm.xlu1 %1460, %v402_v18  }
  0x82   : > { %1461 = vset.pattern.permute.xlu1 %v1536_v25 }
  0x83   : > { %637 = vperm.xlu1 %1461, %v594_v19  }
  0x87   : > { %1462 = vset.pattern.permute.xlu1 %v1533_v1 }
  0x88   : > { %232 = vperm.xlu1 %1462, %v203_v7  }
  0x8c   : > { %1463 = vset.pattern.permute.xlu1 %v1534_v2 }
  0x8d   : > { %424 = vperm.xlu1 %1463, %v395_v20  }
  0x91   : > { %448 = vperm.xlu1 %1463, %v403_v21  }
  0x95   : > { %1464 = vset.pattern.permute.xlu1 %v1536_v25 }
  0x96   : > { %640 = vperm.xlu1 %1464, %v595_v22  }
  0x98   : > { %v1795_v26 = vpop.permute.xlu0 %214 }
  0x99   : > { %vm261_vm11 = vcmp.eq.s32.totalorder %v1795_v26, %v1793_v24  ;;  %vm262_vm12 = vcmp.eq.s32.totalorder %v1795_v26, %v1801_v28 }
  0x9a   : > { %1465 = vset.pattern.permute.xlu1 %v1533_v1  ;;  %v1798_v27 = vpop.permute.xlu1 %406  ;;  %v1219_v8 = vsel %vm261_vm11, 1.0, %v1537_v33  ;;  %v1220_v9 = vsel %vm262_vm12, 1.0, %v1537_v33 }
  0x9b   : > { %235 = vperm.xlu1 %1465, %v204_v10   ;;  %vm453_vm13 = vcmp.eq.s32.totalorder %v1798_v27, %v1793_v24  ;;  %vm454_vm14 = vcmp.eq.s32.totalorder %v1798_v27, %v1801_v28 }
  0x9c   : > { %v239_v29 = vpop.permute.xlu0 %238  ;;  %v1251_v10 = vsel %vm453_vm13, 1.0, %v1537_v33  ;;  %v1252_v11 = vsel %vm454_vm14, 1.0, %v1537_v33 }
  0x9d   : > { %vm277_vm0 = vcmp.eq.s32.totalorder %v239_v29, %v1793_v24  ;;  %vm278_vm1 = vcmp.eq.s32.totalorder %v239_v29, %v1801_v28  ;;  %v549_v13 = vadd.f32 %v1251_v10, %v1219_v8  ;;  %v550_v15 = vadd.f32 %v1252_v11, %v1220_v9 }
  0x9e   : > { %v431_v31 = vpop.permute.xlu1 %430  ;;  %v1235_v34 = vsel %vm277_vm0, 1.0, %v1537_v33  ;;  %v1236_v35 = vsel %vm278_vm1, 1.0, %v1537_v33 }
  0x9f   : > { %vm469_vm2 = vcmp.eq.s32.totalorder %v431_v31, %v1793_v24  ;;  %vm470_vm3 = vcmp.eq.s32.totalorder %v431_v31, %v1801_v28  ;;  %1467 = vset.pattern.permute.xlu1 %v1534_v2 }
  0xa0   : > { %427 = vperm.xlu1 %1467, %v396_v30   ;;  %v242_v1 = vpop.permute.xlu0 %241  ;;  %v1267_v36 = vsel %vm469_vm2, 1.0, %v1537_v33  ;;  %v1268_v37 = vsel %vm470_vm3, 1.0, %v1537_v33 }
  0xa1   : > { %v565_v39 = vadd.f32 %v1267_v36, %v1235_v34  ;;  %v566_v40 = vadd.f32 %v1268_v37, %v1236_v35  ;;  %vm279_vm7 = vcmp.eq.s32.totalorder %v242_v1, %v1793_v24  ;;  %vm280_vm8 = vcmp.eq.s32.totalorder %v242_v1, %v1801_v28 }
  0xa2   : > { %v1237_v55 = vsel %vm279_vm7, 1.0, %v1537_v33  ;;  %v1238_v56 = vsel %vm280_vm8, 1.0, %v1537_v33 }
  0xa3   : > { %v623_v38 = vpop.permute.xlu1 %622 }
  0xa4   : > { %vm661_vm4 = vcmp.eq.s32.totalorder %v623_v38, %v1793_v24  ;;  %vm662_vm5 = vcmp.eq.s32.totalorder %v623_v38, %v1801_v28  ;;  %451 = vperm.xlu1 %1467, %v404_v32   ;;  %v1815_v2 = vpop.permute.xlu0 %244 }
  0xa5   : > { %v1299_v41 = vsel %vm661_vm4, 1.0, %v1537_v33  ;;  %v1300_v42 = vsel %vm662_vm5, 1.0, %v1537_v33  ;;  %vm281_vm8 = vcmp.eq.s32.totalorder %v1815_v2, %v1793_v24 }
  0xa6   : > { %v757_v44 = vadd.f32 %v1299_v41, %v565_v39  ;;  %v758_v45 = vadd.f32 %v1300_v42, %v566_v40  ;;  %v1239_v35 = vsel %vm281_vm8, 1.0, %v1537_v33 }
  0xa8   : > { %1468 = vset.pattern.permute.xlu1 %v1536_v25  ;;  %1323 = vmatprep.mubr.msk.f32.mxu1 %vm797_vm6, %v758_v45  ;;  %v1822_v46 = vpop.permute.xlu1 %217  ;;  %v1824_v47 = vpop.permute.xlu0 %247  ;;  %v1009_v25 = vld [vmem:[%s1833_s4 + $0x8] sm:$0xff] }
  0xa9   : > { %643 = vperm.xlu1 %1468, %v596_v43   ;;  %951 = vmatmul.mubr.f32.vlgmr.msra.gmra.mrb[0].mxu1 %v757_v44  ;;  %vm263_vm3 = vcmp.eq.s32.totalorder %v1822_v46, %v1793_v24  ;;  %vm264_vm4 = vcmp.eq.s32.totalorder %v1822_v46, %v1801_v28 }
  0xaa   : > { %1042 = vrot.lane.b32.xlu0 %v1009_v25, %s1538_s5  ;;  %v1221_v20 = vsel %vm263_vm3, 1.0, %v1537_v33  ;;  %v1222_v21 = vsel %vm264_vm4, 1.0, %v1537_v33 }
  0xac   : > { %v1826_v49 = vpop.permute.xlu0 %250 }
  0xad   : > { %v410_v50 = vpop.permute.xlu1 %409  ;;  %1040 = vrot.lane.b32.xlu1 %v1008_v48, %s1538_s5 }
  0xae   : > { %1046 = vrot.lane.b32.xlu0 %v1011_v53, %s1538_s5  ;;  %vm455_vm1 = vcmp.eq.s32.totalorder %v410_v50, %v1793_v24  ;;  %vm456_vm2 = vcmp.eq.s32.totalorder %v410_v50, %v1801_v28 }
  0xaf   : > { %v1253_v16 = vsel %vm455_vm1, 1.0, %v1537_v33  ;;  %v1254_v17 = vsel %vm456_vm2, 1.0, %v1537_v33 }
  0xb0   : > { %v1837_v51 = vpop.permute.xlu0 %253  ;;  %v551_v27 = vadd.f32 %v1253_v16, %v1221_v20  ;;  %v552_v29 = vadd.f32 %v1254_v17, %v1222_v21 }
  0xb1   : > { %v434_v52 = vpop.permute.xlu1 %433  ;;  %1044 = vrot.lane.b32.xlu1 %v1010_v54, %s1538_s5 }
  0xb2   : > { %vm471_vm9 = vcmp.eq.s32.totalorder %v434_v52, %v1793_v24  ;;  %vm472_vm10 = vcmp.eq.s32.totalorder %v434_v52, %v1801_v28  ;;  %1050 = vrot.lane.b32.xlu0 %v1013_v60, %s1538_s5 }
  0xb3   : > { %v1269_v57 = vsel %vm471_vm9, 1.0, %v1537_v33  ;;  %v1270_v58 = vsel %vm472_vm10, 1.0, %v1537_v33  ;;  %vm282_vm9 = vcmp.eq.s32.totalorder %v1815_v2, %v1801_v28 }
  0xb4   : > { %v1851_v59 = vpop.permute.xlu0 %256  ;;  %v567_v63 = vadd.f32 %v1269_v57, %v1237_v55  ;;  %v568_v0 = vadd.f32 %v1270_v58, %v1238_v56  ;;  %v1240_v36 = vsel %vm282_vm9, 1.0, %v1537_v33 }
  0xb5   : > { %1048 = vrot.lane.b32.xlu1 %v1012_v61, %s1538_s5 }
  0xb6   : > { %v626_v62 = vpop.permute.xlu1 %625 }
  0xb7   : > { %vm663_vm15 = vcmp.eq.s32.totalorder %v626_v62, %v1793_v24  ;;  %vm664_vm0 = vcmp.eq.s32.totalorder %v626_v62, %v1801_v28 }
  0xb8   : > { %v1301_v3 = vsel %vm663_vm15, 1.0, %v1537_v33  ;;  %v1302_v4 = vsel %vm664_vm0, 1.0, %v1537_v33  ;;  %v1869_v5 = vpop.permute.xlu0 %259 }
  0xb9   : > { %v759_v6 = vadd.f32 %v1301_v3, %v567_v63  ;;  %v760_v7 = vadd.f32 %v1302_v4, %v568_v0 }
  0xbb   : > { %1324 = vmatprep.mubr.msk.f32.mxu1 %vm797_vm6, %v760_v7  ;;  %v221_v12 = vpop.permute.xlu1 %220 }
  0xbc   : > { %956 = vmatmul.mubr.f32.gmra.mrb[2].mxu1 %v759_v6  ;;  %vm265_vm12 = vcmp.eq.s32.totalorder %v221_v12, %v1793_v24  ;;  %vm266_vm13 = vcmp.eq.s32.totalorder %v221_v12, %v1801_v28 }
  0xbd   : > { %v599_v14 = vpop.permute.xlu0 %598  ;;  %v1223_v40 = vsel %vm265_vm12, 1.0, %v1537_v33  ;;  %v1224_v41 = vsel %vm266_vm13, 1.0, %v1537_v33  ;;  %vm283_vm13 = vcmp.eq.s32.totalorder %v1824_v47, %v1793_v24 }
  0xbe   : > { %vm645_vm5 = vcmp.eq.s32.totalorder %v599_v14, %v1793_v24  ;;  %vm646_vm7 = vcmp.eq.s32.totalorder %v599_v14, %v1801_v28 }
  0xbf   : > { %v1283_v18 = vsel %vm645_vm5, 1.0, %v1537_v33  ;;  %v1284_v19 = vsel %vm646_vm7, 1.0, %v1537_v33 }
  0xc0   : > { %v741_v22 = vadd.f32 %v1283_v18, %v549_v13  ;;  %v413_v23 = vpop.permute.xlu1 %412  ;;  %v742_v26 = vadd.f32 %v1284_v19, %v550_v15  ;;  %v1241_v13 = vsel %vm283_vm13, 1.0, %v1537_v33  ;;  %vm286_vm13 = vcmp.eq.s32.totalorder %v1826_v49, %v1801_v28 }
  0xc1   : > { %vm457_vm10 = vcmp.eq.s32.totalorder %v413_v23, %v1793_v24  ;;  %vm458_vm11 = vcmp.eq.s32.totalorder %v413_v23, %v1801_v28  ;;  %v602_v30 = vpop.permute.xlu0 %601 }
  0xc2   : > { %vm647_vm14 = vcmp.eq.s32.totalorder %v602_v30, %v1793_v24  ;;  %vm648_vm15 = vcmp.eq.s32.totalorder %v602_v30, %v1801_v28  ;;  %1315 = vmatprep.mubr.msk.f32.mxu0 %vm797_vm6, %v742_v26  ;;  %v1255_v31 = vsel %vm457_vm10, 1.0, %v1537_v33  ;;  %v1256_v1 = vsel %vm458_vm11, 1.0, %v1537_v33 }
  0xc3   : > { %v1285_v32 = vsel %vm647_vm14, 1.0, %v1537_v33  ;;  %v1286_v34 = vsel %vm648_vm15, 1.0, %v1537_v33  ;;  %911 = vmatmul.mubr.f32.vlgmr.msra.gmra.mrb[0].mxu0 %v741_v22  ;;  %v553_v43 = vadd.f32 %v1255_v31, %v1223_v40  ;;  %v554_v44 = vadd.f32 %v1256_v1, %v1224_v41 }
  0xc4   : > { %v743_v37 = vadd.f32 %v1285_v32, %v551_v27  ;;  %v744_v38 = vadd.f32 %v1286_v34, %v552_v29  ;;  %v437_v39 = vpop.permute.xlu1 %436  ;;  %vm284_vm14 = vcmp.eq.s32.totalorder %v1824_v47, %v1801_v28 }
  0xc5   : > { %vm473_vm0 = vcmp.eq.s32.totalorder %v437_v39, %v1793_v24  ;;  %vm474_vm1 = vcmp.eq.s32.totalorder %v437_v39, %v1801_v28  ;;  %v605_v42 = vpop.permute.xlu0 %604  ;;  %v1242_v14 = vsel %vm284_vm14, 1.0, %v1537_v33 }
  0xc6   : > { %vm649_vm2 = vcmp.eq.s32.totalorder %v605_v42, %v1793_v24  ;;  %vm650_vm3 = vcmp.eq.s32.totalorder %v605_v42, %v1801_v28  ;;  %1316 = vmatprep.mubr.msk.f32.mxu0 %vm797_vm6, %v744_v38  ;;  %v1271_v2 = vsel %vm473_vm0, 1.0, %v1537_v33  ;;  %v1272_v45 = vsel %vm474_vm1, 1.0, %v1537_v33 }
  0xc7   : > { %v1287_v46 = vsel %vm649_vm2, 1.0, %v1537_v33  ;;  %v1288_v50 = vsel %vm650_vm3, 1.0, %v1537_v33  ;;  %916 = vmatmul.mubr.f32.gmra.mrb[2].mxu0 %v743_v37  ;;  %v569_v53 = vadd.f32 %v1271_v2, %v1239_v35  ;;  %v570_v54 = vadd.f32 %v1272_v45, %v1240_v36 }
  0xc8   : > { %v745_v25 = vadd.f32 %v1287_v46, %v553_v43  ;;  %v746_v48 = vadd.f32 %v1288_v50, %v554_v44  ;;  %v1244_v43 = vsel %vm286_vm13, 1.0, %v1537_v33 }
  0xc9   : > { %v629_v52 = vpop.permute.xlu1 %628  ;;  %v608_v61 = vpop.permute.xlu0 %607 }
  0xca   : > { %vm665_vm4 = vcmp.eq.s32.totalorder %v629_v52, %v1793_v24  ;;  %vm666_vm5 = vcmp.eq.s32.totalorder %v629_v52, %v1801_v28  ;;  %1317 = vmatprep.mubr.msk.f32.mxu0 %vm797_vm6, %v746_v48  ;;  %vm651_vm7 = vcmp.eq.s32.totalorder %v608_v61, %v1793_v24  ;;  %vm652_vm8 = vcmp.eq.s32.totalorder %v608_v61, %v1801_v28 }
  0xcb   : > { %v1303_v55 = vsel %vm665_vm4, 1.0, %v1537_v33  ;;  %v1304_v56 = vsel %vm666_vm5, 1.0, %v1537_v33  ;;  %921 = vmatmul.mubr.f32.gmra.mrb[4].mxu0 %v745_v25  ;;  %v1289_v63 = vsel %vm651_vm7, 1.0, %v1537_v33  ;;  %v1290_v0 = vsel %vm652_vm8, 1.0, %v1537_v33 }
  0xcc   : > { %v761_v57 = vadd.f32 %v1303_v55, %v569_v53  ;;  %v762_v58 = vadd.f32 %v1304_v56, %v570_v54 }
  0xcd   : > { %v611_v26 = vpop.permute.xlu0 %610 }
  0xce   : > { %1325 = vmatprep.mubr.msk.f32.mxu1 %vm797_vm6, %v762_v58  ;;  %v224_v60 = vpop.permute.xlu1 %223  ;;  %vm653_vm3 = vcmp.eq.s32.totalorder %v611_v26, %v1793_v24  ;;  %vm654_vm4 = vcmp.eq.s32.totalorder %v611_v26, %v1801_v28 }
  0xcf   : > { %961 = vmatmul.mubr.f32.gmra.mrb[4].mxu1 %v761_v57  ;;  %vm267_vm9 = vcmp.eq.s32.totalorder %v224_v60, %v1793_v24  ;;  %vm268_vm10 = vcmp.eq.s32.totalorder %v224_v60, %v1801_v28  ;;  %v1291_v29 = vsel %vm653_vm3, 1.0, %v1537_v33  ;;  %v1292_v30 = vsel %vm654_vm4, 1.0, %v1537_v33 }
  0xd0   : > { %v1225_v3 = vsel %vm267_vm9, 1.0, %v1537_v33  ;;  %v1226_v4 = vsel %vm268_vm10, 1.0, %v1537_v33 }
  0xd1   : > { %v614_v52 = vpop.permute.xlu0 %613 }
  0xd3   : > { %v416_v62 = vpop.permute.xlu1 %415 }
  0xd4   : > { %vm459_vm11 = vcmp.eq.s32.totalorder %v416_v62, %v1793_v24  ;;  %vm460_vm12 = vcmp.eq.s32.totalorder %v416_v62, %v1801_v28 }
  0xd5   : > { %v1257_v6 = vsel %vm459_vm11, 1.0, %v1537_v33  ;;  %v1258_v7 = vsel %vm460_vm12, 1.0, %v1537_v33  ;;  %vm285_vm12 = vcmp.eq.s32.totalorder %v1826_v49, %v1793_v24 }
  0xd6   : > { %v555_v8 = vadd.f32 %v1257_v6, %v1225_v3  ;;  %v556_v9 = vadd.f32 %v1258_v7, %v1226_v4  ;;  %v1243_v42 = vsel %vm285_vm12, 1.0, %v1537_v33  ;;  %v1015_v4 = vld [vmem:[%s1833_s4 + $0x38] sm:$0xff]  ;;  %v1014_v6 = vld [vmem:[%s1833_s4 + $0x30] sm:$0xff] }
  0xd7   : > { %v440_v10 = vpop.permute.xlu1 %439  ;;  %1054 = vrot.lane.b32.xlu0 %v1015_v4, %s1538_s5  ;;  %1052 = vrot.lane.b32.xlu1 %v1014_v6, %s1538_s5 }
  0xd8   : > { %v747_v11 = vadd.f32 %v1289_v63, %v555_v8  ;;  %v748_v12 = vadd.f32 %v1290_v0, %v556_v9  ;;  %vm475_vm15 = vcmp.eq.s32.totalorder %v440_v10, %v1793_v24  ;;  %vm476_vm0 = vcmp.eq.s32.totalorder %v440_v10, %v1801_v28  ;;  %v1017_v9 = vld [vmem:[%s1833_s4 + $0x48] sm:$0xff]  ;;  %v1016_v10 = vld [vmem:[%s1833_s4 + $0x40] sm:$0xff] }
  0xd9   : > { %v1273_v15 = vsel %vm475_vm15, 1.0, %v1537_v33  ;;  %v1274_v16 = vsel %vm476_vm0, 1.0, %v1537_v33  ;;  %vm655_vm0 = vcmp.eq.s32.totalorder %v614_v52, %v1793_v24 }
  0xda   : > { %1318 = vmatprep.mubr.msk.f32.mxu0 %vm797_vm6, %v748_v12  ;;  %v571_v47 = vadd.f32 %v1273_v15, %v1241_v13  ;;  %v572_v18 = vadd.f32 %v1274_v16, %v1242_v14  ;;  %v1293_v54 = vsel %vm655_vm0, 1.0, %v1537_v33 }
  0xdb   : > { %926 = vmatmul.mubr.f32.gmra.mrb[6].mxu0 %v747_v11  ;;  %1058 = vrot.lane.b32.xlu0 %v1017_v9, %s1538_s5 }
  0xdc   : > { %v632_v17 = vpop.permute.xlu1 %631  ;;  %1056 = vrot.lane.b32.xlu1 %v1016_v10, %s1538_s5 }
  0xdd   : > { %vm667_vm1 = vcmp.eq.s32.totalorder %v632_v17, %v1793_v24  ;;  %vm668_vm2 = vcmp.eq.s32.totalorder %v632_v17, %v1801_v28  ;;  %v1019_v17 = vld [vmem:[%s1833_s4 + $0x58] sm:$0xff] }
  0xde   : > { %v1305_v19 = vsel %vm667_vm1, 1.0, %v1537_v33  ;;  %v1306_v20 = vsel %vm668_vm2, 1.0, %v1537_v33  ;;  %vm656_vm1 = vcmp.eq.s32.totalorder %v614_v52, %v1801_v28 }
  0xdf   : > { %v763_v21 = vadd.f32 %v1305_v19, %v571_v47  ;;  %v764_v22 = vadd.f32 %v1306_v20, %v572_v18  ;;  %v1294_v55 = vsel %vm656_vm1, 1.0, %v1537_v33  ;;  %v1018_v19 = vld [vmem:[%s1833_s4 + $0x50] sm:$0xff]  ;;  %1062 = vrot.lane.b32.xlu0 %v1019_v17, %s1538_s5 }
  0xe0   : > { %1060 = vrot.lane.b32.xlu1 %v1018_v19, %s1538_s5 }
  0xe1   : > { %1326 = vmatprep.mubr.msk.f32.mxu1 %vm797_vm6, %v764_v22  ;;  %v227_v23 = vpop.permute.xlu1 %226  ;;  %v1020_v22 = vld [vmem:[%s1833_s4 + $0x60] sm:$0xff] }
  0xe2   : > { %966 = vmatmul.mubr.f32.gmra.mrb[6].mxu1 %v763_v21  ;;  %vm269_vm5 = vcmp.eq.s32.totalorder %v227_v23, %v1793_v24  ;;  %vm270_vm7 = vcmp.eq.s32.totalorder %v227_v23, %v1801_v28  ;;  %v1021_v21 = vld [vmem:[%s1833_s4 + $0x68] sm:$0xff]  ;;  %v617_v23 = vpop.permute.xlu0 %616 }
  0xe3   : > { %v1227_v31 = vsel %vm269_vm5, 1.0, %v1537_v33  ;;  %v1228_v1 = vsel %vm270_vm7, 1.0, %v1537_v33  ;;  %vm287_vm7 = vcmp.eq.s32.totalorder %v1837_v51, %v1793_v24  ;;  %1066 = vrot.lane.b32.xlu0 %v1021_v21, %s1538_s5  ;;  %vm658_vm0 = vcmp.eq.s32.totalorder %v617_v23, %v1801_v28 }
  0xe4   : > { %v1245_v11 = vsel %vm287_vm7, 1.0, %v1537_v33  ;;  %1064 = vrot.lane.b32.xlu1 %v1020_v22, %s1538_s5  ;;  %vm290_vm7 = vcmp.eq.s32.totalorder %v1851_v59, %v1801_v28 }
  0xe6   : > { %v419_v27 = vpop.permute.xlu1 %418  ;;  %v620_v52 = vpop.permute.xlu0 %619 }
  0xe7   : > { %vm461_vm8 = vcmp.eq.s32.totalorder %v419_v27, %v1793_v24  ;;  %vm462_vm9 = vcmp.eq.s32.totalorder %v419_v27, %v1801_v28 }
  0xe8   : > { %v1259_v32 = vsel %vm461_vm8, 1.0, %v1537_v33  ;;  %v1260_v34 = vsel %vm462_vm9, 1.0, %v1537_v33 }
  0xe9   : > { %v557_v35 = vadd.f32 %v1259_v32, %v1227_v31  ;;  %v558_v36 = vadd.f32 %v1260_v34, %v1228_v1 }
  0xea   : > { %v443_v37 = vpop.permute.xlu1 %442 }
  0xeb   : > { %v749_v38 = vadd.f32 %v1291_v29, %v557_v35  ;;  %v750_v39 = vadd.f32 %v1292_v30, %v558_v36  ;;  %vm477_vm10 = vcmp.eq.s32.totalorder %v443_v37, %v1793_v24  ;;  %vm478_vm11 = vcmp.eq.s32.totalorder %v443_v37, %v1801_v28  ;;  %v1023_v37 = vld [vmem:[%s1833_s4 + $0x78] sm:$0xff] }
  0xec   : > { %v1275_v40 = vsel %vm477_vm10, 1.0, %v1537_v33  ;;  %v1276_v41 = vsel %vm478_vm11, 1.0, %v1537_v33  ;;  %vm288_vm10 = vcmp.eq.s32.totalorder %v1837_v51, %v1801_v28  ;;  %v1296_v35 = vsel %vm658_vm0, 1.0, %v1537_v33  ;;  %1070 = vrot.lane.b32.xlu0 %v1023_v37, %s1538_s5 }
  0xed   : > { %1319 = vmatprep.mubr.msk.f32.mxu0 %vm797_vm6, %v750_v39  ;;  %v573_v2 = vadd.f32 %v1275_v40, %v1243_v42  ;;  %v574_v45 = vadd.f32 %v1276_v41, %v1244_v43  ;;  %v1246_v12 = vsel %vm288_vm10, 1.0, %v1537_v33 }
  0xee   : > { %931 = vmatmul.mubr.f32.gmra.mrb[8].mxu0 %v749_v38  ;;  %v1022_v38 = vld [vmem:[%s1833_s4 + $0x70] sm:$0xff] }
  0xef   : > { %v635_v44 = vpop.permute.xlu1 %634  ;;  %1068 = vrot.lane.b32.xlu1 %v1022_v38, %s1538_s5 }
  0xf0   : > { %vm669_vm14 = vcmp.eq.s32.totalorder %v635_v44, %v1793_v24  ;;  %vm670_vm15 = vcmp.eq.s32.totalorder %v635_v44, %v1801_v28  ;;  %v1248_v44 = vsel %vm290_vm7, 1.0, %v1537_v33  ;;  %vm991_vm7 = vcmask 392192  }
  0xf1   : > { %v1307_v49 = vsel %vm669_vm14, 1.0, %v1537_v33  ;;  %v1308_v46 = vsel %vm670_vm15, 1.0, %v1537_v33  ;;  %vm657_vm15 = vcmp.eq.s32.totalorder %v617_v23, %v1793_v24 }
  0xf2   : > { %v765_v50 = vadd.f32 %v1307_v49, %v573_v2  ;;  %v766_v25 = vadd.f32 %v1308_v46, %v574_v45  ;;  %v1295_v34 = vsel %vm657_vm15, 1.0, %v1537_v33 }
  0xf4   : > { %1327 = vmatprep.mubr.msk.f32.mxu1 %vm797_vm6, %v766_v25  ;;  %v230_v48 = vpop.permute.xlu1 %229 }
  0xf5   : > { %971 = vmatmul.mubr.f32.gmra.mrb[8].mxu1 %v765_v50  ;;  %vm271_vm2 = vcmp.eq.s32.totalorder %v230_v48, %v1793_v24  ;;  %vm272_vm3 = vcmp.eq.s32.totalorder %v230_v48, %v1801_v28 }
  0xf6   : > { %v1229_v56 = vsel %vm271_vm2, 1.0, %v1537_v33  ;;  %v1230_v57 = vsel %vm272_vm3, 1.0, %v1537_v33 }
  0xf9   : > { %v422_v53 = vpop.permute.xlu1 %421 }
  0xfa   : > { %vm463_vm4 = vcmp.eq.s32.totalorder %v422_v53, %v1793_v24  ;;  %vm464_vm5 = vcmp.eq.s32.totalorder %v422_v53, %v1801_v28 }
  0xfb   : > { %v1261_v58 = vsel %vm463_vm4, 1.0, %v1537_v33  ;;  %v1262_v60 = vsel %vm464_vm5, 1.0, %v1537_v33  ;;  %vm289_vm5 = vcmp.eq.s32.totalorder %v1851_v59, %v1793_v24 }
  0xfc   : > { %v559_v61 = vadd.f32 %v1261_v58, %v1229_v56  ;;  %v560_v62 = vadd.f32 %v1262_v60, %v1230_v57  ;;  %v1247_v43 = vsel %vm289_vm5, 1.0, %v1537_v33 }
  0xfd   : > { %v446_v63 = vpop.permute.xlu1 %445 }
  0xfe   : > { %v751_v0 = vadd.f32 %v1293_v54, %v559_v61  ;;  %v752_v3 = vadd.f32 %v1294_v55, %v560_v62  ;;  %vm479_vm8 = vcmp.eq.s32.totalorder %v446_v63, %v1793_v24  ;;  %vm480_vm9 = vcmp.eq.s32.totalorder %v446_v63, %v1801_v28 }
  0xff   : > { %v1277_v7 = vsel %vm479_vm8, 1.0, %v1537_v33  ;;  %v1278_v8 = vsel %vm480_vm9, 1.0, %v1537_v33 }
 0x100   : > { %1320 = vmatprep.mubr.msk.f32.mxu0 %vm797_vm6, %v752_v3  ;;  %v575_v13 = vadd.f32 %v1277_v7, %v1245_v11  ;;  %v576_v15 = vadd.f32 %v1278_v8, %v1246_v12 }
 0x101   : > { %936 = vmatmul.mubr.f32.gmra.mrb[10].mxu0 %v751_v0 }
 0x102   : > { %v638_v14 = vpop.permute.xlu1 %637 }
 0x103   : > { %vm671_vm11 = vcmp.eq.s32.totalorder %v638_v14, %v1793_v24  ;;  %vm672_vm12 = vcmp.eq.s32.totalorder %v638_v14, %v1801_v28 }
 0x104   : > { %v1309_v51 = vsel %vm671_vm11, 1.0, %v1537_v33  ;;  %v1310_v16 = vsel %vm672_vm12, 1.0, %v1537_v33  ;;  %vm659_vm12 = vcmp.eq.s32.totalorder %v620_v52, %v1793_v24 }
 0x105   : > { %v767_v47 = vadd.f32 %v1309_v51, %v575_v13  ;;  %v768_v18 = vadd.f32 %v1310_v16, %v576_v15  ;;  %v1297_v61 = vsel %vm659_vm12, 1.0, %v1537_v33 }
 0x107   : > { %1328 = vmatprep.mubr.msk.f32.mxu1 %vm797_vm6, %v768_v18  ;;  %v233_v20 = vpop.permute.xlu1 %232 }
 0x108   : > { %976 = vmatmul.mubr.f32.gmra.mrb[10].mxu1 %v767_v47  ;;  %vm273_vm13 = vcmp.eq.s32.totalorder %v233_v20, %v1793_v24  ;;  %vm274_vm14 = vcmp.eq.s32.totalorder %v233_v20, %v1801_v28 }
 0x109   : > { %v1231_v27 = vsel %vm273_vm13, 1.0, %v1537_v33  ;;  %v1232_v29 = vsel %vm274_vm14, 1.0, %v1537_v33  ;;  %vm660_vm13 = vcmp.eq.s32.totalorder %v620_v52, %v1801_v28 }
 0x10a   : > { %v1298_v62 = vsel %vm660_vm13, 1.0, %v1537_v33 }
 0x10c   : > { %v425_v26 = vpop.permute.xlu1 %424 }
 0x10d   : > { %vm465_vm1 = vcmp.eq.s32.totalorder %v425_v26, %v1793_v24  ;;  %vm466_vm2 = vcmp.eq.s32.totalorder %v425_v26, %v1801_v28 }
 0x10e   : > { %v1263_v30 = vsel %vm465_vm1, 1.0, %v1537_v33  ;;  %v1264_v31 = vsel %vm466_vm2, 1.0, %v1537_v33  ;;  %vm291_vm2 = vcmp.eq.s32.totalorder %v1869_v5, %v1793_v24 }
 0x10f   : > { %v561_v1 = vadd.f32 %v1263_v30, %v1231_v27  ;;  %v562_v32 = vadd.f32 %v1264_v31, %v1232_v29  ;;  %v1249_v7 = vsel %vm291_vm2, 1.0, %v1537_v33 }
 0x110   : > { %v449_v36 = vpop.permute.xlu1 %448 }
 0x111   : > { %v754_v39 = vadd.f32 %v1296_v35, %v562_v32  ;;  %vm481_vm3 = vcmp.eq.s32.totalorder %v449_v36, %v1793_v24  ;;  %vm482_vm4 = vcmp.eq.s32.totalorder %v449_v36, %v1801_v28  ;;  %v753_v40 = vadd.f32 %v1295_v34, %v561_v1 }
 0x112   : > { %v1279_v41 = vsel %vm481_vm3, 1.0, %v1537_v33  ;;  %v1280_v42 = vsel %vm482_vm4, 1.0, %v1537_v33  ;;  %vm292_vm3 = vcmp.eq.s32.totalorder %v1869_v5, %v1801_v28 }
 0x113   : > { %1321 = vmatprep.mubr.msk.f32.mxu0 %vm797_vm6, %v754_v39  ;;  %v577_v45 = vadd.f32 %v1279_v41, %v1247_v43  ;;  %v578_v49 = vadd.f32 %v1280_v42, %v1248_v44  ;;  %v1250_v8 = vsel %vm292_vm3, 1.0, %v1537_v33 }
 0x114   : > { %941 = vmatmul.mubr.f32.gmra.mrb[12].mxu0 %v753_v40 }
 0x115   : > { %v641_v2 = vpop.permute.xlu1 %640 }
 0x116   : > { %vm673_vm8 = vcmp.eq.s32.totalorder %v641_v2, %v1793_v24  ;;  %vm674_vm9 = vcmp.eq.s32.totalorder %v641_v2, %v1801_v28 }
 0x117   : > { %v1311_v59 = vsel %vm673_vm8, 1.0, %v1537_v33  ;;  %v1312_v46 = vsel %vm674_vm9, 1.0, %v1537_v33  ;;  %vm1105_vm8 = vcmask 1047952  }
 0x118   : > { %v769_v50 = vadd.f32 %v1311_v59, %v577_v45  ;;  %v770_v25 = vadd.f32 %v1312_v46, %v578_v49 }
 0x11a   : > { %1329 = vmatprep.mubr.msk.f32.mxu1 %vm797_vm6, %v770_v25  ;;  %v236_v48 = vpop.permute.xlu1 %235 }
 0x11b   : > { %981 = vmatmul.mubr.f32.gmra.mrb[12].mxu1 %v769_v50  ;;  %vm275_vm10 = vcmp.eq.s32.totalorder %v236_v48, %v1793_v24  ;;  %vm276_vm11 = vcmp.eq.s32.totalorder %v236_v48, %v1801_v28 }
 0x11c   : > { %v1233_v54 = vsel %vm275_vm10, 1.0, %v1537_v33  ;;  %v1234_v55 = vsel %vm276_vm11, 1.0, %v1537_v33  ;;  %v1043_v17 = vpop.permute.xlu0 %1042 }
 0x11f   : > { %v428_v53 = vpop.permute.xlu1 %427 }
 0x120   : > { %vm467_vm14 = vcmp.eq.s32.totalorder %v428_v53, %v1793_v24  ;;  %vm468_vm15 = vcmp.eq.s32.totalorder %v428_v53, %v1801_v28 }
 0x121   : > { %v1265_v56 = vsel %vm467_vm14, 1.0, %v1537_v33  ;;  %v1266_v57 = vsel %vm468_vm15, 1.0, %v1537_v33 }
 0x122   : > { %v563_v58 = vadd.f32 %v1265_v56, %v1233_v54  ;;  %v564_v60 = vadd.f32 %v1266_v57, %v1234_v55 }
 0x123   : > { %v452_v63 = vpop.permute.xlu1 %451 }
 0x124   : > { %v756_v0 = vadd.f32 %v1298_v62, %v564_v60  ;;  %vm483_vm0 = vcmp.eq.s32.totalorder %v452_v63, %v1793_v24  ;;  %vm484_vm1 = vcmp.eq.s32.totalorder %v452_v63, %v1801_v28  ;;  %v755_v3 = vadd.f32 %v1297_v61, %v563_v58 }
 0x125   : > { %v1281_v4 = vsel %vm483_vm0, 1.0, %v1537_v33  ;;  %v1282_v6 = vsel %vm484_vm1, 1.0, %v1537_v33 }
 0x126   : > { %1322 = vmatprep.mubr.msk.f32.mxu0 %vm797_vm6, %v756_v0  ;;  %v579_v10 = vadd.f32 %v1281_v4, %v1249_v7  ;;  %v580_v11 = vadd.f32 %v1282_v6, %v1250_v8 }
 0x127   : > { %946 = vmatmul.mubr.f32.gmra.mrb[14].mxu0 %v755_v3 }
 0x128   : > { %v644_v9 = vpop.permute.xlu1 %643 }
 0x129   : > { %vm675_vm4 = vcmp.eq.s32.totalorder %v644_v9, %v1793_v24  ;;  %vm676_vm5 = vcmp.eq.s32.totalorder %v644_v9, %v1801_v28  ;;  %v1047_v24 = vpop.permute.xlu0 %1046 }
 0x12a   : > { %v1313_v5 = vsel %vm675_vm4, 1.0, %v1537_v33  ;;  %v1314_v12 = vsel %vm676_vm5, 1.0, %v1537_v33 }
 0x12b   : > { %v771_v13 = vadd.f32 %v1313_v5, %v579_v10  ;;  %v772_v14 = vadd.f32 %v1314_v12, %v580_v11 }
 0x12c   : > { %v1041_v15 = vpop.permute.xlu1 %1040 }
 0x12d   : > { %1330 = vmatprep.mubr.msk.f32.mxu1 %vm797_vm6, %v772_v14  ;;  %vm1088_vm6 = vcmask 408960   ;;  %v1051_v20 = vpop.permute.xlu0 %1050 }
 0x12e   : > { %986 = vmatmul.mubr.f32.gmra.mrb[14].mxu1 %v771_v13 }
 0x130   : > { %v1045_v51 = vpop.permute.xlu1 %1044 }
 0x134   : > { %v1049_v16 = vpop.permute.xlu1 %1048 }
 0x149   : > { %v2108_v47 = vpop.permute.xlu1 %1052  ;;  %v2121_v21 = vpop.permute.xlu0 %1054 }
 0x14d   : > { %v1059_v22 = vpop.permute.xlu0 %1058 }
 0x14e   : > { %v1057_v28 = vpop.permute.xlu1 %1056 }
 0x151   : > { %v1063_v39 = vpop.permute.xlu0 %1062 }
 0x152   : > { %v1061_v34 = vpop.permute.xlu1 %1060 }
 0x155   : > { %v1067_v46 = vpop.permute.xlu0 %1066 }
 0x156   : > { %v1065_v44 = vpop.permute.xlu1 %1064 }
 0x15e   : > { %v1071_v58 = vpop.permute.xlu0 %1070 }
 0x161   : > { %v1069_v53 = vpop.permute.xlu1 %1068 }
 0x17c   : > { %v952_v18 = vpop.f32.mrb[0].mxu1 }
 0x17d   : > { %1000 = vst.msk [vmem:[%s2112_s7 + $0x40] sm:$0xff] %vm991_vm7, %v952_v18  ;;  %v954_v19 = vpop.f32.mrb[1].mxu1 }
 0x17e   : > { %1097 = vst.msk [vmem:[%s2112_s7 + $0x40] sm:$0xff] %vm1088_vm6, %v1057_v28 }
 0x17f   : > { %1114 = vst.msk [vmem:[%s2112_s7 + $0x40] sm:$0xff] %vm1105_vm8, %v1537_v33 }
 0x18f   : > { %v957_v23 = vpop.f32.mrb[2].mxu1 }
 0x190   : > { %1001 = vst.msk [vmem:[%s2112_s7 + $0x48] sm:$0xff] %vm991_vm7, %v957_v23  ;;  %v959_v26 = vpop.f32.mrb[3].mxu1 }
 0x191   : > { %1098 = vst.msk [vmem:[%s2112_s7 + $0x48] sm:$0xff] %vm1088_vm6, %v1059_v22 }
 0x192   : > { %1115 = vst.msk [vmem:[%s2112_s7 + $0x48] sm:$0xff] %vm1105_vm8, %v1537_v33 }
 0x196   : > { %v912_v27 = vpop.f32.mrb[0].mxu0 }
 0x197   : > { %992 = vst.msk [vmem:[%s2112_s7] sm:$0xff] %vm991_vm7, %v912_v27  ;;  %v914_v29 = vpop.f32.mrb[1].mxu0 }
 0x198   : > { %1089 = vst.msk [vmem:[%s2112_s7] sm:$0xff] %vm1088_vm6, %v1041_v15 }
 0x199   : > { %1106 = vst.msk [vmem:[%s2112_s7] sm:$0xff] %vm1105_vm8, %v1537_v33 }
 0x19a   : > { %v917_v30 = vpop.f32.mrb[2].mxu0 }
 0x19b   : > { %993 = vst.msk [vmem:[%s2112_s7 + $0x8] sm:$0xff] %vm991_vm7, %v917_v30  ;;  %v919_v31 = vpop.f32.mrb[3].mxu0 }
 0x19c   : > { %1090 = vst.msk [vmem:[%s2112_s7 + $0x8] sm:$0xff] %vm1088_vm6, %v1043_v17 }
 0x19d   : > { %1107 = vst.msk [vmem:[%s2112_s7 + $0x8] sm:$0xff] %vm1105_vm8, %v1537_v33 }
 0x19e   : > { %v922_v1 = vpop.f32.mrb[4].mxu0 }
 0x19f   : > { %994 = vst.msk [vmem:[%s2112_s7 + $0x10] sm:$0xff] %vm991_vm7, %v922_v1  ;;  %v924_v32 = vpop.f32.mrb[5].mxu0 }
 0x1a0   : > { %1091 = vst.msk [vmem:[%s2112_s7 + $0x10] sm:$0xff] %vm1088_vm6, %v1045_v51 }
 0x1a1   : > { %1108 = vst.msk [vmem:[%s2112_s7 + $0x10] sm:$0xff] %vm1105_vm8, %v1537_v33 }
 0x1a2   : > { %v962_v35 = vpop.f32.mrb[4].mxu1 }
 0x1a3   : > { %1002 = vst.msk [vmem:[%s2112_s7 + $0x50] sm:$0xff] %vm991_vm7, %v962_v35  ;;  %v964_v36 = vpop.f32.mrb[5].mxu1 }
 0x1a4   : > { %1099 = vst.msk [vmem:[%s2112_s7 + $0x50] sm:$0xff] %vm1088_vm6, %v1061_v34 }
 0x1a5   : > { %1116 = vst.msk [vmem:[%s2112_s7 + $0x50] sm:$0xff] %vm1105_vm8, %v1537_v33 }
 0x1ae   : > { %v927_v37 = vpop.f32.mrb[6].mxu0 }
 0x1af   : > { %995 = vst.msk [vmem:[%s2112_s7 + $0x18] sm:$0xff] %vm991_vm7, %v927_v37  ;;  %v929_v38 = vpop.f32.mrb[7].mxu0 }
 0x1b0   : > { %1092 = vst.msk [vmem:[%s2112_s7 + $0x18] sm:$0xff] %vm1088_vm6, %v1047_v24 }
 0x1b1   : > { %1109 = vst.msk [vmem:[%s2112_s7 + $0x18] sm:$0xff] %vm1105_vm8, %v1537_v33 }
 0x1b5   : > { %v967_v40 = vpop.f32.mrb[6].mxu1 }
 0x1b6   : > { %1003 = vst.msk [vmem:[%s2112_s7 + $0x58] sm:$0xff] %vm991_vm7, %v967_v40  ;;  %v969_v41 = vpop.f32.mrb[7].mxu1 }
 0x1b7   : > { %1100 = vst.msk [vmem:[%s2112_s7 + $0x58] sm:$0xff] %vm1088_vm6, %v1063_v39 }
 0x1b8   : > { %1117 = vst.msk [vmem:[%s2112_s7 + $0x58] sm:$0xff] %vm1105_vm8, %v1537_v33 }
 0x1c1   : > { %v932_v42 = vpop.f32.mrb[8].mxu0 }
 0x1c2   : > { %996 = vst.msk [vmem:[%s2112_s7 + $0x20] sm:$0xff] %vm991_vm7, %v932_v42  ;;  %v934_v43 = vpop.f32.mrb[9].mxu0 }
 0x1c3   : > { %1093 = vst.msk [vmem:[%s2112_s7 + $0x20] sm:$0xff] %vm1088_vm6, %v1049_v16 }
 0x1c4   : > { %1110 = vst.msk [vmem:[%s2112_s7 + $0x20] sm:$0xff] %vm1105_vm8, %v1537_v33 }
 0x1c8   : > { %v972_v2 = vpop.f32.mrb[8].mxu1 }
 0x1c9   : > { %1004 = vst.msk [vmem:[%s2112_s7 + $0x60] sm:$0xff] %vm991_vm7, %v972_v2  ;;  %v974_v45 = vpop.f32.mrb[9].mxu1 }
 0x1ca   : > { %1101 = vst.msk [vmem:[%s2112_s7 + $0x60] sm:$0xff] %vm1088_vm6, %v1065_v44 }
 0x1cb   : > { %1118 = vst.msk [vmem:[%s2112_s7 + $0x60] sm:$0xff] %vm1105_vm8, %v1537_v33 }
 0x1d4   : > { %v937_v49 = vpop.f32.mrb[10].mxu0 }
 0x1d5   : > { %997 = vst.msk [vmem:[%s2112_s7 + $0x28] sm:$0xff] %vm991_vm7, %v937_v49  ;;  %v939_v59 = vpop.f32.mrb[11].mxu0 }
 0x1d6   : > { %1094 = vst.msk [vmem:[%s2112_s7 + $0x28] sm:$0xff] %vm1088_vm6, %v1051_v20 }
 0x1d7   : > { %1111 = vst.msk [vmem:[%s2112_s7 + $0x28] sm:$0xff] %vm1105_vm8, %v1537_v33 }
 0x1db   : > { %v977_v50 = vpop.f32.mrb[10].mxu1 }
 0x1dc   : > { %1005 = vst.msk [vmem:[%s2112_s7 + $0x68] sm:$0xff] %vm991_vm7, %v977_v50  ;;  %v979_v25 = vpop.f32.mrb[11].mxu1 }
 0x1dd   : > { %1102 = vst.msk [vmem:[%s2112_s7 + $0x68] sm:$0xff] %vm1088_vm6, %v1067_v46 }
 0x1de   : > { %1119 = vst.msk [vmem:[%s2112_s7 + $0x68] sm:$0xff] %vm1105_vm8, %v1537_v33 }
 0x1e7   : > { %v942_v48 = vpop.f32.mrb[12].mxu0 }
 0x1e8   : > { %998 = vst.msk [vmem:[%s2112_s7 + $0x30] sm:$0xff] %vm991_vm7, %v942_v48  ;;  %v944_v52 = vpop.f32.mrb[13].mxu0 }
 0x1e9   : > { %1095 = vst.msk [vmem:[%s2112_s7 + $0x30] sm:$0xff] %vm1088_vm6, %v2108_v47 }
 0x1ea   : > { %1112 = vst.msk [vmem:[%s2112_s7 + $0x30] sm:$0xff] %vm1105_vm8, %v1537_v33 }
 0x1ee   : > { %v982_v54 = vpop.f32.mrb[12].mxu1 }
 0x1ef   : > { %1006 = vst.msk [vmem:[%s2112_s7 + $0x70] sm:$0xff] %vm991_vm7, %v982_v54  ;;  %v984_v55 = vpop.f32.mrb[13].mxu1 }
 0x1f0   : > { %1103 = vst.msk [vmem:[%s2112_s7 + $0x70] sm:$0xff] %vm1088_vm6, %v1069_v53 }
 0x1f1   : > { %1120 = vst.msk [vmem:[%s2112_s7 + $0x70] sm:$0xff] %vm1105_vm8, %v1537_v33 }
 0x1fa   : > { %v947_v56 = vpop.f32.mrb[14].mxu0 }
 0x1fb   : > { %999 = vst.msk [vmem:[%s2112_s7 + $0x38] sm:$0xff] %vm991_vm7, %v947_v56  ;;  %v949_v57 = vpop.f32.mrb[15].mxu0 }
 0x1fc   : > { %1096 = vst.msk [vmem:[%s2112_s7 + $0x38] sm:$0xff] %vm1088_vm6, %v2121_v21 }
 0x1fd   : > { %1113 = vst.msk [vmem:[%s2112_s7 + $0x38] sm:$0xff] %vm1105_vm8, %v1537_v33 }
 0x201   : > { %v987_v60 = vpop.f32.mrb[14].mxu1 }
 0x202   : > { %1007 = vst.msk [vmem:[%s2112_s7 + $0x78] sm:$0xff] %vm991_vm7, %v987_v60  ;;  %v989_v61 = vpop.f32.mrb[15].mxu1 }
 0x203   : > { %1104 = vst.msk [vmem:[%s2112_s7 + $0x78] sm:$0xff] %vm1088_vm6, %v1071_v58 }
 0x204   : > { %1121 = vst.msk [vmem:[%s2112_s7 + $0x78] sm:$0xff] %vm1105_vm8, %v1537_v33 }
 0x205   : > { %1482 = shalt.err (!%p1479_p3)
}
 0x206   : > { %s1483_s28 = scalar_lea.hbm %s2228_s17, 2048  ;;  %s1487_s30 = scalar_lea.hbm %s2285_s3, 4096 }
 0x207   : > { %p1484_p4 = scmp.ne.s32.totalorder %s2228_s17, %s1483_s28  ;;  %p1488_p9 = scmp.lt.u32.totalorder %s2228_s17, %s2285_s3 }
 0x208   : > { %p1489_p10 = scmp.lt.u32.totalorder %s1487_s30, %s1483_s28  ;;  %p1491_p12 = scmp.lt.u32.totalorder %s1483_s28, %s2228_s17 }
 0x209   : > { %p1485_p7 = pnand %p1484_p4, %p1600_p5 }
 0x20a   : > { %p1490_p11 = por %p1489_p10, %p1488_p9 }
 0x20b   : > { %p1486_p8 = pneg %p1485_p7 }
 0x20c   : > { %p1492_p13 = por %p1491_p12, %p1490_p11 }
 0x20e   : > { %p1493_p0 = pnand %p1492_p13, %p1486_p8 }
 0x210   : > { %1496 = shalt.err (!%p1493_p0)
}
 0x211   : > { %s1540_s24 = smov 128   ;;  %s1541_s6 = smov 8  }
 0x212   : > { %1397 = dma.vmem_to_hbm [thread:$0]  (%p1600_p5), %s2230_s9, 2048, %s2228_s17, %s2241_s16, %s1540_s24, %s1540_s24, %s1541_s6  }
 0x213 PF: > { %p1403_p1 = scmp.ge.s32.totalorder %s1531_s15, 2  ;;  %s1151_s7 = sand.u32 1, %s1519_s12  }
 0x214   : > { %s1152_s8 = scalar_lea.sflag [#allocation3], %s1151_s7 }
 0x215   : > { %p1400_p2 = pnand %p1403_p1, %p1604_p6 }
 0x217   : > { %1514 = dma.done.wait (!%p1400_p2), %s1152_s8, 2048  }
 0x218   : > { %1516 = vsyncadd (!%p1400_p2), %s1152_s8, 4294965248  ;;  %p13_p3 = scmp.ge.s32.totalorder %s1587_s18, 4   ;;  %s2288_s12 = smov %s1523_s13 }
 0x219   : > { %s2289_s13 = smov %s1527_s14  ;;  %s2290_s14 = smov %s1598_s21 }
 0x21a   : > { %s2291_s15 = smov %s1587_s18  ;;  %15 = sbr.rel (!%p13_p3) target bundleno = 3 (0x3), region = 70 }
 0x221   :  { %1157 = vsyncpa [#allocation3], 1 }
 0x222   :  { %1159 = vsyncpa [#allocation3 + $0x1], 1 }

// kernel: tpu_custom_call.1
= control target key start
LH: loop header
LB: loop body
LE: loop exit
PB: predicated region body
PF: predicated region fallthrough
CT: control target
= control target key end

     0   :  { %8 = vsyncpa [#allocation3], 0  ;;  %s2282_s0 = inlined_call_operand.vmem [shape: s32[256,3], index: 0, kind: input, shape index: {}]   ;;  %s2283_s1 = inlined_call_operand.vmem [shape: f32[256,2], index: 1, kind: input, shape index: {}]   ;;  %s2284_s2 = inlined_call_operand.vmem [shape: f32[192,48], index: 2, kind: input, shape index: {}]   ;;  %s2285_s3 = inlined_call_operand.hbm [shape: f32[256,128], index: 3, kind: output, shape index: {}]  }
   0x1   :  { %10 = vsyncpa [#allocation3 + $0x1], 0  ;;  %s1562_s12 = smov 0   ;;  %s1564_s13 = smov 0  }
   0x2   :  { %s1566_s14 = smov 0   ;;  %s1568_s15 = smov 0  }
   0x3 LB: > { %s1583_s16 = sadd.s32 4294967295, %s1531_s15   ;;  %s1210_s17 = sadd.s32 4294967294, %s1531_s15   ;;  %s1531_s15 = sphi %s1568_s15, %s2291_s15   ;;  %s1527_s14 = sphi %s1566_s14, %s2290_s14   ;;  %s1523_s13 = sphi %s1564_s13, %s2289_s13   ;;  %s1519_s12 = sphi %s1562_s12, %s2288_s12  }
   0x4   : > { %s1587_s18 = sadd.s32 1, %s1531_s15   ;;  %s96_s19 = sadd.s32 1, %s1527_s14 }
   0x5   : > { %s93_s20 = ssub.s32 %s1531_s15, %s1587_s18  ;;  %p106_p0 = scmp.ne.s32.totalorder %s1527_s14, %s1523_s13 }
   0x6   : > { %p94_p1 = scmp.eq.s32.totalorder %s93_s20, 0  ;;  %p107_p2 = scmp.eq.s32.totalorder %s1583_s16, 1 }
   0x7   : > { %p112_p3 = scmp.ne.s32.totalorder %s1523_s13, %s1519_s12  ;;  %p113_p4 = scmp.eq.s32.totalorder %s1210_s17, 1 }
   0x8   : > { %s1598_s21 = scalar_select %p94_p1, %s1527_s14, %s96_s19  }
   0x9   : > { %p1600_p5 = por %p107_p2, %p106_p0  ;;  %p1604_p6 = por %p113_p4, %p112_p3 }
   0xa   : > { %p1213_p7 = scmp.ge.s32.totalorder %s1531_s15, 1  ;;  %p152_p8 = scmp.lt.s32.totalorder %s1531_s15, 3 }
   0xc   : > { %p153_p9 = pnand %p1213_p7, %p152_p8 }
   0xd   : > { %s1215_s24 = sshll.u32 (!%p153_p9), %s1583_s16, 4  ;;  %v773_v0 = vld [vmem:[%s2284_s2] sm:$0xff] (!%p153_p9)  ;;  %v1533_v1 = vmov (!%p153_p9), 0   ;;  %v1534_v2 = vmov (!%p153_p9), 1   ;;  %v774_v3 = vld [vmem:[%s2284_s2 + $0x8] sm:$0xff] (!%p153_p9)  ;;  %v775_v4 = vld [vmem:[%s2284_s2 + $0x10] sm:$0xff] (!%p153_p9) }
   0xe   : > { %156 = sbr.rel (%p153_p9) target bundleno = 531 (0x213), region = 32  ;;  %1444 = vset.pattern.permute.xlu0 (!%p153_p9), %v1533_v1  ;;  %p182_p10 = scmp.lt.s32.totalorder (!%p153_p9), %s1215_s24, 31  ;;  %1445 = vset.pattern.permute.xlu1 (!%p153_p9), %v1534_v2  ;;  %v776_v5 = vld [vmem:[%s2284_s2 + $0x18] sm:$0xff] (!%p153_p9)  ;;  %v1535_v6 = vmov (!%p153_p9), 0.0|0.0   ;;  %v1338_v7 = vpack.c.bf16 (!%p153_p9), %v774_v3, %v773_v0  ;;  %v777_v9 = vld [vmem:[%s2284_s2 + $0x20] sm:$0xff] (!%p153_p9)  ;;  %v778_v10 = vld [vmem:[%s2284_s2 + $0x28] sm:$0xff] (!%p153_p9) }
   0xf   : > { %1373 = vmatprep.subr.bf16.mxu1 (!%p153_p9), %v1535_v6  ;;  %1337 = vmatprep.subr.bf16.mxu0 (!%p153_p9), %v1535_v6  ;;  %v1341_v8 = vpack.c.bf16 (!%p153_p9), %v776_v5, %v775_v4  ;;  %v1344_v14 = vpack.c.bf16 (!%p153_p9), %v778_v10, %v777_v9  ;;  %v779_v15 = vld [vmem:[%s2284_s2 + $0x30] sm:$0xff] (!%p153_p9)  ;;  %v780_v16 = vld [vmem:[%s2284_s2 + $0x38] sm:$0xff] (!%p153_p9)  ;;  %v781_v20 = vld [vmem:[%s2284_s2 + $0x40] sm:$0xff] (!%p153_p9)  ;;  %v1536_v25 = vmov (!%p153_p9), 2   ;;  %vm797_vm6 = vcmask (!%p153_p9), 523264   ;;  %s1538_s5 = smov (!%p153_p9), 48  }
  0x10   : > { %1385 = vmatpush1.bf16.msra.mxu1 (!%p153_p9), %v1338_v7  ;;  %1339 = vmatpush1.bf16.msra.mxu0 (!%p153_p9), %v1338_v7  ;;  %v1347_v18 = vpack.c.bf16 (!%p153_p9), %v780_v16, %v779_v15  ;;  %v782_v21 = vld [vmem:[%s2284_s2 + $0x48] sm:$0xff] (!%p153_p9)  ;;  %v783_v26 = vld [vmem:[%s2284_s2 + $0x50] sm:$0xff] (!%p153_p9)  ;;  %v784_v27 = vld [vmem:[%s2284_s2 + $0x58] sm:$0xff] (!%p153_p9)  ;;  %s1336_s8 = sshll.u32 (!%p153_p9), %s1583_s16, 11  ;;  %s1539_s25 = smov (!%p153_p9), [#allocation2]  }
  0x11   : > { %1374 = vmatprep.subr.bf16.mxu1 (!%p153_p9), %v1535_v6  ;;  %1340 = vmatprep.subr.bf16.mxu0 (!%p153_p9), %v1535_v6  ;;  %v1350_v23 = vpack.c.bf16 (!%p153_p9), %v782_v21, %v781_v20  ;;  %v1353_v30 = vpack.c.bf16 (!%p153_p9), %v784_v27, %v783_v26  ;;  %v785_v31 = vld [vmem:[%s2284_s2 + $0x60] sm:$0xff] (!%p153_p9)  ;;  %v786_v32 = vld [vmem:[%s2284_s2 + $0x68] sm:$0xff] (!%p153_p9)  ;;  %v787_v36 = vld [vmem:[%s2284_s2 + $0x70] sm:$0xff] (!%p153_p9)  ;;  %s2228_s17 = scalar_lea.hbm (!%p153_p9), %s2285_s3, %s1336_s8  ;;  %s1473_s26 = sshll.u32 (!%p153_p9), %s1539_s25, 4  ;;  %s1474_s26 = int_to_ptr.vmem [resolvable:$false] %s1473_s26 }
  0x12   : > { %v1356_v35 = vpack.c.bf16 (!%p153_p9), %v786_v32, %v785_v31  ;;  %v788_v37 = vld [vmem:[%s2284_s2 + $0x78] sm:$0xff] (!%p153_p9)  ;;  %v789_v41 = vld [vmem:[%s2284_s2 + $0x80] sm:$0xff] (!%p153_p9)  ;;  %v790_v42 = vld [vmem:[%s2284_s2 + $0x88] sm:$0xff] (!%p153_p9)  ;;  %s1475_s27 = scalar_lea.vmem (!%p153_p9), %s1474_s26, 4096 }
  0x13   : > { %v1359_v40 = vpack.c.bf16 (!%p153_p9), %v788_v37, %v787_v36  ;;  %v1362_v44 = vpack.c.bf16 (!%p153_p9), %v790_v42, %v789_v41  ;;  %v791_v46 = vld [vmem:[%s2284_s2 + $0x90] sm:$0xff] (!%p153_p9)  ;;  %v792_v47 = vld [vmem:[%s2284_s2 + $0x98] sm:$0xff] (!%p153_p9)  ;;  %v793_v50 = vld [vmem:[%s2284_s2 + $0xa0] sm:$0xff] (!%p153_p9) }
  0x14   : > { %1386 = vmatpush1.bf16.msra.mxu1 (!%p153_p9), %v1341_v8  ;;  %1342 = vmatpush1.bf16.msra.mxu0 (!%p153_p9), %v1341_v8  ;;  %v1365_v49 = vpack.c.bf16 (!%p153_p9), %v792_v47, %v791_v46  ;;  %v794_v51 = vld [vmem:[%s2284_s2 + $0xa8] sm:$0xff] (!%p153_p9)  ;;  %v795_v55 = vld [vmem:[%s2284_s2 + $0xb0] sm:$0xff] (!%p153_p9)  ;;  %v796_v56 = vld [vmem:[%s2284_s2 + $0xb8] sm:$0xff] (!%p153_p9) }
  0x15   : > { %s2293_s24 = smov (!%p182_p10, %s1215_s24), 31  ;;  %1375 = vmatprep.subr.bf16.mxu1 %v1535_v6  ;;  %1343 = vmatprep.subr.bf16.mxu0 %v1535_v6  ;;  %v1368_v54 = vpack.c.bf16 %v794_v51, %v793_v50  ;;  %v1371_v59 = vpack.c.bf16 %v796_v56, %v795_v55 }
  0x16   : > { %s1216_s6 = sshll.u32 %s2293_s24, 3  ;;  %s178_s24 = sand.u32 1, %s1523_s13  }
  0x17   : > { %s1643_s19 = scalar_lea.vmem %s2282_s0, %s1216_s6  ;;  %s1833_s4 = scalar_lea.vmem %s2283_s1, %s1216_s6 }
  0x18   : > { %v1646_v11 = vld [vmem:[%s1643_s19] sm:$0xff]  ;;  %1387 = vmatpush1.bf16.msra.mxu1 %v1344_v14  ;;  %v206_v19 = vld [vmem:[%s1643_s19 + $0x48] sm:$0xff]  ;;  %1345 = vmatpush1.bf16.msra.mxu0 %v1344_v14  ;;  %v1669_v24 = vld [vmem:[%s1643_s19 + $0x50] sm:$0xff]  ;;  %s1214_s6 = sshll.u32 %s178_s24, 7  ;;  %s2241_s16 = scalar_lea.sflag [#allocation3], %s178_s24 }
  0x19   : > { %v205_v12 = vld [vmem:[%s1643_s19 + $0x40] sm:$0xff]  ;;  %214 = vperm.xlu0 %1444, %v1646_v11   ;;  %v389_v13 = vadd.s32 64, %v1646_v11  ;;  %1376 = vmatprep.subr.bf16.mxu1 %v1535_v6  ;;  %v1682_v28 = vld [vmem:[%s1643_s19 + $0x58] sm:$0xff]  ;;  %v1685_v29 = vld [vmem:[%s1643_s19 + $0x8] sm:$0xff]  ;;  %v398_v39 = vadd.s32 64, %v206_v19  ;;  %v590_v45 = vadd.s32 128, %v206_v19 }
  0x1a   : > { %v397_v17 = vadd.s32 64, %v205_v12  ;;  %1346 = vmatprep.subr.bf16.mxu0 %v1535_v6  ;;  %v589_v22 = vadd.s32 128, %v205_v12  ;;  %v1699_v33 = vld [vmem:[%s1643_s19 + $0x60] sm:$0xff]  ;;  %v390_v34 = vadd.s32 64, %v1685_v29  ;;  %v1713_v38 = vld [vmem:[%s1643_s19 + $0x68] sm:$0xff]  ;;  %v1725_v43 = vld [vmem:[%s1643_s19 + $0x70] sm:$0xff] }
  0x1b   : > { %406 = vperm.xlu1 %1445, %v389_v13   ;;  %v1738_v48 = vld [vmem:[%s1643_s19 + $0x78] sm:$0xff]  ;;  %v199_v52 = vld [vmem:[%s1643_s19 + $0x10] sm:$0xff]  ;;  %v581_v53 = vadd.s32 128, %v1646_v11  ;;  %v582_v58 = vadd.s32 128, %v1685_v29  ;;  %v399_v60 = vadd.s32 64, %v1669_v24  ;;  %v591_v63 = vadd.s32 128, %v1669_v24 }
  0x1c   : > { %1388 = vmatpush1.bf16.msra.mxu1 %v1347_v18  ;;  %1348 = vmatpush1.bf16.msra.mxu0 %v1347_v18  ;;  %v391_v57 = vadd.s32 64, %v199_v52  ;;  %v583_v61 = vadd.s32 128, %v199_v52  ;;  %v200_v62 = vld [vmem:[%s1643_s19 + $0x18] sm:$0xff]  ;;  %v201_v3 = vld [vmem:[%s1643_s19 + $0x20] sm:$0xff]  ;;  %v202_v5 = vld [vmem:[%s1643_s19 + $0x28] sm:$0xff]  ;;  %v400_v11 = vadd.s32 64, %v1682_v28 }
  0x1d   : > { %238 = vperm.xlu0 %1444, %v205_v12   ;;  %1377 = vmatprep.subr.bf16.mxu1 %v1535_v6  ;;  %v584_v0 = vadd.s32 128, %v200_v62  ;;  %v585_v4 = vadd.s32 128, %v201_v3  ;;  %v203_v7 = vld [vmem:[%s1643_s19 + $0x30] sm:$0xff]  ;;  %v392_v8 = vadd.s32 64, %v200_v62  ;;  %v204_v10 = vld [vmem:[%s1643_s19 + $0x38] sm:$0xff]  ;;  %v592_v13 = vadd.s32 128, %v1682_v28 }
  0x1e   : > { %1349 = vmatprep.subr.bf16.mxu0 %v1535_v6  ;;  %v587_v9 = vadd.s32 128, %v203_v7  ;;  %v588_v12 = vadd.s32 128, %v204_v10  ;;  %v393_v14 = vadd.s32 64, %v201_v3  ;;  %v401_v15 = vadd.s32 64, %v1699_v33  ;;  %s2112_s7 = scalar_lea.vmem [#allocation2], %s1214_s6 }
  0x1f   : > { %430 = vperm.xlu1 %1445, %v397_v17   ;;  %v593_v16 = vadd.s32 128, %v1699_v33  ;;  %v394_v17 = vadd.s32 64, %v202_v5  ;;  %v402_v18 = vadd.s32 64, %v1713_v38  ;;  %v395_v20 = vadd.s32 64, %v203_v7  ;;  %s1136_s9 = sshll.u32 %s2112_s7, 4  ;;  %s2230_s9 = int_to_ptr.vmem [resolvable:$true] %s1136_s9 }
  0x20   : > { %1389 = vmatpush1.bf16.msra.mxu1 %v1350_v23  ;;  %1351 = vmatpush1.bf16.msra.mxu0 %v1350_v23  ;;  %v403_v21 = vadd.s32 64, %v1725_v43  ;;  %v194_v23 = vlaneseq  ;;  %v404_v32 = vadd.s32 64, %v1738_v48  ;;  %s1469_s20 = scalar_lea.vmem %s2230_s9, 2048  ;;  %p1476_p0 = scmp.lt.s32.totalorder %s2230_s9, %s1474_s26 }
  0x21   : > { %241 = vperm.xlu0 %1444, %v206_v19   ;;  %1378 = vmatprep.subr.bf16.mxu1 %v1535_v6  ;;  %v594_v19 = vadd.s32 128, %v1713_v38  ;;  %p1470_p11 = scmp.ne.s32.totalorder %s2230_s9, %s1469_s20  ;;  %p1477_p1 = scmp.lt.s32.totalorder %s1475_s27, %s1469_s20 }
  0x22   : > { %1352 = vmatprep.subr.bf16.mxu0 %v1535_v6 }
  0x23   : > { %1446 = vset.pattern.permute.xlu1 %v1536_v25  ;;  %p1471_p12 = pnand %p1470_p11, %p1600_p5  ;;  %p1478_p2 = por %p1477_p1, %p1476_p0 }
  0x24   : > { %622 = vperm.xlu1 %1446, %v589_v22   ;;  %1390 = vmatpush1.bf16.msra.mxu1 %v1353_v30  ;;  %v595_v22 = vadd.s32 128, %v1725_v43 }
  0x25   : > { %244 = vperm.xlu0 %1444, %v1669_v24   ;;  %1354 = vmatpush1.bf16.msra.mxu0 %v1353_v30  ;;  %v1793_v24 = vand.u32 127, %v194_v23  ;;  %v396_v30 = vadd.s32 64, %v204_v10  ;;  %p1472_p13 = pneg %p1471_p12 }
  0x26   : > { %1379 = vmatprep.subr.bf16.mxu1 %v1535_v6  ;;  %1355 = vmatprep.subr.bf16.mxu0 %v1535_v6 }
  0x27   : > { %p1479_p3 = pnand %p1478_p2, %p1472_p13 }
  0x28   : > { %1447 = vset.pattern.permute.xlu1 %v1533_v1  ;;  %1391 = vmatpush1.bf16.msra.mxu1 %v1356_v35 }
  0x29   : > { %247 = vperm.xlu0 %1444, %v1682_v28   ;;  %217 = vperm.xlu1 %1447, %v1685_v29   ;;  %v1801_v28 = vadd.s32 128, %v1793_v24 }
  0x2a   : > { %1380 = vmatprep.subr.bf16.mxu1 %v1535_v6  ;;  %1357 = vmatpush1.bf16.msra.mxu0 %v1356_v35 }
  0x2b   : > { %1358 = vmatprep.subr.bf16.mxu0 %v1535_v6 }
  0x2c   : > { %1392 = vmatpush1.bf16.msra.mxu1 %v1359_v40 }
  0x2d   : > { %250 = vperm.xlu0 %1444, %v1699_v33   ;;  %1448 = vset.pattern.permute.xlu1 %v1534_v2  ;;  %v1537_v33 = vmov 0.0  }
  0x2e   : > { %409 = vperm.xlu1 %1448, %v390_v34   ;;  %1381 = vmatprep.subr.bf16.mxu1 %v1535_v6 }
  0x2f   : > { %1360 = vmatpush1.bf16.msra.mxu0 %v1359_v40 }
  0x30   : > { %1361 = vmatprep.subr.bf16.mxu0 %v1535_v6  ;;  %1393 = vmatpush1.bf16.msra.mxu1 %v1362_v44 }
  0x31   : > { %253 = vperm.xlu0 %1444, %v1713_v38   ;;  %1382 = vmatprep.subr.bf16.mxu1 %v1535_v6 }
  0x32   : > { %433 = vperm.xlu1 %1448, %v398_v39  }
  0x33   : > { %1363 = vmatpush1.bf16.msra.mxu0 %v1362_v44 }
  0x34   : > { %1364 = vmatprep.subr.bf16.mxu0 %v1535_v6  ;;  %1394 = vmatpush1.bf16.msra.mxu1 %v1365_v49 }
  0x35   : > { %256 = vperm.xlu0 %1444, %v1725_v43   ;;  %1383 = vmatprep.subr.bf16.mxu1 %v1535_v6  ;;  %v596_v43 = vadd.s32 128, %v1738_v48 }
  0x36   : > { %1449 = vset.pattern.permute.xlu1 %v1536_v25 }
  0x37   : > { %625 = vperm.xlu1 %1449, %v590_v45   ;;  %1366 = vmatpush1.bf16.msra.mxu0 %v1365_v49 }
  0x38   : > { %1367 = vmatprep.subr.bf16.mxu0 %v1535_v6  ;;  %1395 = vmatpush1.bf16.msra.mxu1 %v1368_v54 }
  0x39   : > { %259 = vperm.xlu0 %1444, %v1738_v48   ;;  %1384 = vmatprep.subr.bf16.mxu1 %v1535_v6  ;;  %v1008_v48 = vld [vmem:[%s1833_s4] sm:$0xff] }
  0x3b   : > { %1450 = vset.pattern.permute.xlu1 %v1533_v1  ;;  %1369 = vmatpush1.bf16.msra.mxu0 %v1368_v54  ;;  %v1010_v54 = vld [vmem:[%s1833_s4 + $0x10] sm:$0xff] }
  0x3c   : > { %220 = vperm.xlu1 %1450, %v199_v52   ;;  %1370 = vmatprep.subr.bf16.mxu0 %v1535_v6  ;;  %v586_v6 = vadd.s32 128, %v202_v5 }
  0x3d   : > { %1466 = vset.pattern.permute.xlu0 %v1536_v25  ;;  %1396 = vmatpush1.bf16.msra.mxu1 %v1371_v59 }
  0x3e   : > { %598 = vperm.xlu0 %1466, %v581_v53   ;;  %v1011_v53 = vld [vmem:[%s1833_s4 + $0x18] sm:$0xff] }
  0x3f   : > { %1372 = vmatpush1.bf16.msra.mxu0 %v1371_v59 }
  0x40   : > { %1451 = vset.pattern.permute.xlu1 %v1534_v2 }
  0x41   : > { %412 = vperm.xlu1 %1451, %v391_v57  }
  0x42   : > { %601 = vperm.xlu0 %1466, %v582_v58  }
  0x45   : > { %436 = vperm.xlu1 %1451, %v399_v60   ;;  %v1013_v60 = vld [vmem:[%s1833_s4 + $0x28] sm:$0xff] }
  0x46   : > { %604 = vperm.xlu0 %1466, %v583_v61   ;;  %v1012_v61 = vld [vmem:[%s1833_s4 + $0x20] sm:$0xff] }
  0x49   : > { %1452 = vset.pattern.permute.xlu1 %v1536_v25 }
  0x4a   : > { %628 = vperm.xlu1 %1452, %v591_v63   ;;  %607 = vperm.xlu0 %1466, %v584_v0  }
  0x4e   : > { %1453 = vset.pattern.permute.xlu1 %v1533_v1  ;;  %610 = vperm.xlu0 %1466, %v585_v4  }
  0x4f   : > { %223 = vperm.xlu1 %1453, %v200_v62  }
  0x52   : > { %613 = vperm.xlu0 %1466, %v586_v6  }
  0x53   : > { %1454 = vset.pattern.permute.xlu1 %v1534_v2 }
  0x54   : > { %415 = vperm.xlu1 %1454, %v392_v8  }
  0x56   : > { %616 = vperm.xlu0 %1466, %v587_v9  }
  0x58   : > { %439 = vperm.xlu1 %1454, %v400_v11  }
  0x5a   : > { %619 = vperm.xlu0 %1466, %v588_v12  }
  0x5c   : > { %1455 = vset.pattern.permute.xlu1 %v1536_v25 }
  0x5d   : > { %631 = vperm.xlu1 %1455, %v592_v13  }
  0x61   : > { %1456 = vset.pattern.permute.xlu1 %v1533_v1 }
  0x62   : > { %226 = vperm.xlu1 %1456, %v201_v3  }
  0x66   : > { %1457 = vset.pattern.permute.xlu1 %v1534_v2 }
  0x67   : > { %418 = vperm.xlu1 %1457, %v393_v14  }
  0x6b   : > { %442 = vperm.xlu1 %1457, %v401_v15  }
  0x6f   : > { %1458 = vset.pattern.permute.xlu1 %v1536_v25 }
  0x70   : > { %634 = vperm.xlu1 %1458, %v593_v16  }
  0x74   : > { %1459 = vset.pattern.permute.xlu1 %v1533_v1 }
  0x75   : > { %229 = vperm.xlu1 %1459, %v202_v5  }
  0x79   : > { %1460 = vset.pattern.permute.xlu1 %v1534_v2 }
  0x7a   : > { %421 = vperm.xlu1 %1460, %v394_v17  }
  0x7e   : > { %445 = vperm.xlu1 %1460, %v402_v18  }
  0x82   : > { %1461 = vset.pattern.permute.xlu1 %v1536_v25 }
  0x83   : > { %637 = vperm.xlu1 %1461, %v594_v19  }
  0x87   : > { %1462 = vset.pattern.permute.xlu1 %v1533_v1 }
  0x88   : > { %232 = vperm.xlu1 %1462, %v203_v7  }
  0x8c   : > { %1463 = vset.pattern.permute.xlu1 %v1534_v2 }
  0x8d   : > { %424 = vperm.xlu1 %1463, %v395_v20  }
  0x91   : > { %448 = vperm.xlu1 %1463, %v403_v21  }
  0x95   : > { %1464 = vset.pattern.permute.xlu1 %v1536_v25 }
  0x96   : > { %640 = vperm.xlu1 %1464, %v595_v22  }
  0x98   : > { %v1795_v26 = vpop.permute.xlu0 %214 }
  0x99   : > { %vm261_vm11 = vcmp.eq.s32.totalorder %v1795_v26, %v1793_v24  ;;  %vm262_vm12 = vcmp.eq.s32.totalorder %v1795_v26, %v1801_v28 }
  0x9a   : > { %1465 = vset.pattern.permute.xlu1 %v1533_v1  ;;  %v1798_v27 = vpop.permute.xlu1 %406  ;;  %v1219_v8 = vsel %vm261_vm11, 1.0, %v1537_v33  ;;  %v1220_v9 = vsel %vm262_vm12, 1.0, %v1537_v33 }
  0x9b   : > { %235 = vperm.xlu1 %1465, %v204_v10   ;;  %vm453_vm13 = vcmp.eq.s32.totalorder %v1798_v27, %v1793_v24  ;;  %vm454_vm14 = vcmp.eq.s32.totalorder %v1798_v27, %v1801_v28 }
  0x9c   : > { %v239_v29 = vpop.permute.xlu0 %238  ;;  %v1251_v10 = vsel %vm453_vm13, 1.0, %v1537_v33  ;;  %v1252_v11 = vsel %vm454_vm14, 1.0, %v1537_v33 }
  0x9d   : > { %vm277_vm0 = vcmp.eq.s32.totalorder %v239_v29, %v1793_v24  ;;  %vm278_vm1 = vcmp.eq.s32.totalorder %v239_v29, %v1801_v28  ;;  %v549_v13 = vadd.f32 %v1251_v10, %v1219_v8  ;;  %v550_v15 = vadd.f32 %v1252_v11, %v1220_v9 }
  0x9e   : > { %v431_v31 = vpop.permute.xlu1 %430  ;;  %v1235_v34 = vsel %vm277_vm0, 1.0, %v1537_v33  ;;  %v1236_v35 = vsel %vm278_vm1, 1.0, %v1537_v33 }
  0x9f   : > { %vm469_vm2 = vcmp.eq.s32.totalorder %v431_v31, %v1793_v24  ;;  %vm470_vm3 = vcmp.eq.s32.totalorder %v431_v31, %v1801_v28  ;;  %1467 = vset.pattern.permute.xlu1 %v1534_v2 }
  0xa0   : > { %427 = vperm.xlu1 %1467, %v396_v30   ;;  %v242_v1 = vpop.permute.xlu0 %241  ;;  %v1267_v36 = vsel %vm469_vm2, 1.0, %v1537_v33  ;;  %v1268_v37 = vsel %vm470_vm3, 1.0, %v1537_v33 }
  0xa1   : > { %v565_v39 = vadd.f32 %v1267_v36, %v1235_v34  ;;  %v566_v40 = vadd.f32 %v1268_v37, %v1236_v35  ;;  %vm279_vm7 = vcmp.eq.s32.totalorder %v242_v1, %v1793_v24  ;;  %vm280_vm8 = vcmp.eq.s32.totalorder %v242_v1, %v1801_v28 }
  0xa2   : > { %v1237_v55 = vsel %vm279_vm7, 1.0, %v1537_v33  ;;  %v1238_v56 = vsel %vm280_vm8, 1.0, %v1537_v33 }
  0xa3   : > { %v623_v38 = vpop.permute.xlu1 %622 }
  0xa4   : > { %vm661_vm4 = vcmp.eq.s32.totalorder %v623_v38, %v1793_v24  ;;  %vm662_vm5 = vcmp.eq.s32.totalorder %v623_v38, %v1801_v28  ;;  %451 = vperm.xlu1 %1467, %v404_v32   ;;  %v1815_v2 = vpop.permute.xlu0 %244 }
  0xa5   : > { %v1299_v41 = vsel %vm661_vm4, 1.0, %v1537_v33  ;;  %v1300_v42 = vsel %vm662_vm5, 1.0, %v1537_v33  ;;  %vm281_vm8 = vcmp.eq.s32.totalorder %v1815_v2, %v1793_v24 }
  0xa6   : > { %v757_v44 = vadd.f32 %v1299_v41, %v565_v39  ;;  %v758_v45 = vadd.f32 %v1300_v42, %v566_v40  ;;  %v1239_v35 = vsel %vm281_vm8, 1.0, %v1537_v33 }
  0xa8   : > { %1468 = vset.pattern.permute.xlu1 %v1536_v25  ;;  %1323 = vmatprep.mubr.msk.f32.mxu1 %vm797_vm6, %v758_v45  ;;  %v1822_v46 = vpop.permute.xlu1 %217  ;;  %v1824_v47 = vpop.permute.xlu0 %247  ;;  %v1009_v25 = vld [vmem:[%s1833_s4 + $0x8] sm:$0xff] }
  0xa9   : > { %643 = vperm.xlu1 %1468, %v596_v43   ;;  %951 = vmatmul.mubr.f32.vlgmr.msra.gmra.mrb[0].mxu1 %v757_v44  ;;  %vm263_vm3 = vcmp.eq.s32.totalorder %v1822_v46, %v1793_v24  ;;  %vm264_vm4 = vcmp.eq.s32.totalorder %v1822_v46, %v1801_v28 }
  0xaa   : > { %1042 = vrot.lane.b32.xlu0 %v1009_v25, %s1538_s5  ;;  %v1221_v20 = vsel %vm263_vm3, 1.0, %v1537_v33  ;;  %v1222_v21 = vsel %vm264_vm4, 1.0, %v1537_v33 }
  0xac   : > { %v1826_v49 = vpop.permute.xlu0 %250 }
  0xad   : > { %v410_v50 = vpop.permute.xlu1 %409  ;;  %1040 = vrot.lane.b32.xlu1 %v1008_v48, %s1538_s5 }
  0xae   : > { %1046 = vrot.lane.b32.xlu0 %v1011_v53, %s1538_s5  ;;  %vm455_vm1 = vcmp.eq.s32.totalorder %v410_v50, %v1793_v24  ;;  %vm456_vm2 = vcmp.eq.s32.totalorder %v410_v50, %v1801_v28 }
  0xaf   : > { %v1253_v16 = vsel %vm455_vm1, 1.0, %v1537_v33  ;;  %v1254_v17 = vsel %vm456_vm2, 1.0, %v1537_v33 }
  0xb0   : > { %v1837_v51 = vpop.permute.xlu0 %253  ;;  %v551_v27 = vadd.f32 %v1253_v16, %v1221_v20  ;;  %v552_v29 = vadd.f32 %v1254_v17, %v1222_v21 }
  0xb1   : > { %v434_v52 = vpop.permute.xlu1 %433  ;;  %1044 = vrot.lane.b32.xlu1 %v1010_v54, %s1538_s5 }
  0xb2   : > { %vm471_vm9 = vcmp.eq.s32.totalorder %v434_v52, %v1793_v24  ;;  %vm472_vm10 = vcmp.eq.s32.totalorder %v434_v52, %v1801_v28  ;;  %1050 = vrot.lane.b32.xlu0 %v1013_v60, %s1538_s5 }
  0xb3   : > { %v1269_v57 = vsel %vm471_vm9, 1.0, %v1537_v33  ;;  %v1270_v58 = vsel %vm472_vm10, 1.0, %v1537_v33  ;;  %vm282_vm9 = vcmp.eq.s32.totalorder %v1815_v2, %v1801_v28 }
  0xb4   : > { %v1851_v59 = vpop.permute.xlu0 %256  ;;  %v567_v63 = vadd.f32 %v1269_v57, %v1237_v55  ;;  %v568_v0 = vadd.f32 %v1270_v58, %v1238_v56  ;;  %v1240_v36 = vsel %vm282_vm9, 1.0, %v1537_v33 }
  0xb5   : > { %1048 = vrot.lane.b32.xlu1 %v1012_v61, %s1538_s5 }
  0xb6   : > { %v626_v62 = vpop.permute.xlu1 %625 }
  0xb7   : > { %vm663_vm15 = vcmp.eq.s32.totalorder %v626_v62, %v1793_v24  ;;  %vm664_vm0 = vcmp.eq.s32.totalorder %v626_v62, %v1801_v28 }
  0xb8   : > { %v1301_v3 = vsel %vm663_vm15, 1.0, %v1537_v33  ;;  %v1302_v4 = vsel %vm664_vm0, 1.0, %v1537_v33  ;;  %v1869_v5 = vpop.permute.xlu0 %259 }
  0xb9   : > { %v759_v6 = vadd.f32 %v1301_v3, %v567_v63  ;;  %v760_v7 = vadd.f32 %v1302_v4, %v568_v0 }
  0xbb   : > { %1324 = vmatprep.mubr.msk.f32.mxu1 %vm797_vm6, %v760_v7  ;;  %v221_v12 = vpop.permute.xlu1 %220 }
  0xbc   : > { %956 = vmatmul.mubr.f32.gmra.mrb[2].mxu1 %v759_v6  ;;  %vm265_vm12 = vcmp.eq.s32.totalorder %v221_v12, %v1793_v24  ;;  %vm266_vm13 = vcmp.eq.s32.totalorder %v221_v12, %v1801_v28 }
  0xbd   : > { %v599_v14 = vpop.permute.xlu0 %598  ;;  %v1223_v40 = vsel %vm265_vm12, 1.0, %v1537_v33  ;;  %v1224_v41 = vsel %vm266_vm13, 1.0, %v1537_v33  ;;  %vm283_vm13 = vcmp.eq.s32.totalorder %v1824_v47, %v1793_v24 }
  0xbe   : > { %vm645_vm5 = vcmp.eq.s32.totalorder %v599_v14, %v1793_v24  ;;  %vm646_vm7 = vcmp.eq.s32.totalorder %v599_v14, %v1801_v28 }
  0xbf   : > { %v1283_v18 = vsel %vm645_vm5, 1.0, %v1537_v33  ;;  %v1284_v19 = vsel %vm646_vm7, 1.0, %v1537_v33 }
  0xc0   : > { %v741_v22 = vadd.f32 %v1283_v18, %v549_v13  ;;  %v413_v23 = vpop.permute.xlu1 %412  ;;  %v742_v26 = vadd.f32 %v1284_v19, %v550_v15  ;;  %v1241_v13 = vsel %vm283_vm13, 1.0, %v1537_v33  ;;  %vm286_vm13 = vcmp.eq.s32.totalorder %v1826_v49, %v1801_v28 }
  0xc1   : > { %vm457_vm10 = vcmp.eq.s32.totalorder %v413_v23, %v1793_v24  ;;  %vm458_vm11 = vcmp.eq.s32.totalorder %v413_v23, %v1801_v28  ;;  %v602_v30 = vpop.permute.xlu0 %601 }
  0xc2   : > { %vm647_vm14 = vcmp.eq.s32.totalorder %v602_v30, %v1793_v24  ;;  %vm648_vm15 = vcmp.eq.s32.totalorder %v602_v30, %v1801_v28  ;;  %1315 = vmatprep.mubr.msk.f32.mxu0 %vm797_vm6, %v742_v26  ;;  %v1255_v31 = vsel %vm457_vm10, 1.0, %v1537_v33  ;;  %v1256_v1 = vsel %vm458_vm11, 1.0, %v1537_v33 }
  0xc3   : > { %v1285_v32 = vsel %vm647_vm14, 1.0, %v1537_v33  ;;  %v1286_v34 = vsel %vm648_vm15, 1.0, %v1537_v33  ;;  %911 = vmatmul.mubr.f32.vlgmr.msra.gmra.mrb[0].mxu0 %v741_v22  ;;  %v553_v43 = vadd.f32 %v1255_v31, %v1223_v40  ;;  %v554_v44 = vadd.f32 %v1256_v1, %v1224_v41 }
  0xc4   : > { %v743_v37 = vadd.f32 %v1285_v32, %v551_v27  ;;  %v744_v38 = vadd.f32 %v1286_v34, %v552_v29  ;;  %v437_v39 = vpop.permute.xlu1 %436  ;;  %vm284_vm14 = vcmp.eq.s32.totalorder %v1824_v47, %v1801_v28 }
  0xc5   : > { %vm473_vm0 = vcmp.eq.s32.totalorder %v437_v39, %v1793_v24  ;;  %vm474_vm1 = vcmp.eq.s32.totalorder %v437_v39, %v1801_v28  ;;  %v605_v42 = vpop.permute.xlu0 %604  ;;  %v1242_v14 = vsel %vm284_vm14, 1.0, %v1537_v33 }
  0xc6   : > { %vm649_vm2 = vcmp.eq.s32.totalorder %v605_v42, %v1793_v24  ;;  %vm650_vm3 = vcmp.eq.s32.totalorder %v605_v42, %v1801_v28  ;;  %1316 = vmatprep.mubr.msk.f32.mxu0 %vm797_vm6, %v744_v38  ;;  %v1271_v2 = vsel %vm473_vm0, 1.0, %v1537_v33  ;;  %v1272_v45 = vsel %vm474_vm1, 1.0, %v1537_v33 }
  0xc7   : > { %v1287_v46 = vsel %vm649_vm2, 1.0, %v1537_v33  ;;  %v1288_v50 = vsel %vm650_vm3, 1.0, %v1537_v33  ;;  %916 = vmatmul.mubr.f32.gmra.mrb[2].mxu0 %v743_v37  ;;  %v569_v53 = vadd.f32 %v1271_v2, %v1239_v35  ;;  %v570_v54 = vadd.f32 %v1272_v45, %v1240_v36 }
  0xc8   : > { %v745_v25 = vadd.f32 %v1287_v46, %v553_v43  ;;  %v746_v48 = vadd.f32 %v1288_v50, %v554_v44  ;;  %v1244_v43 = vsel %vm286_vm13, 1.0, %v1537_v33 }
  0xc9   : > { %v629_v52 = vpop.permute.xlu1 %628  ;;  %v608_v61 = vpop.permute.xlu0 %607 }
  0xca   : > { %vm665_vm4 = vcmp.eq.s32.totalorder %v629_v52, %v1793_v24  ;;  %vm666_vm5 = vcmp.eq.s32.totalorder %v629_v52, %v1801_v28  ;;  %1317 = vmatprep.mubr.msk.f32.mxu0 %vm797_vm6, %v746_v48  ;;  %vm651_vm7 = vcmp.eq.s32.totalorder %v608_v61, %v1793_v24  ;;  %vm652_vm8 = vcmp.eq.s32.totalorder %v608_v61, %v1801_v28 }
  0xcb   : > { %v1303_v55 = vsel %vm665_vm4, 1.0, %v1537_v33  ;;  %v1304_v56 = vsel %vm666_vm5, 1.0, %v1537_v33  ;;  %921 = vmatmul.mubr.f32.gmra.mrb[4].mxu0 %v745_v25  ;;  %v1289_v63 = vsel %vm651_vm7, 1.0, %v1537_v33  ;;  %v1290_v0 = vsel %vm652_vm8, 1.0, %v1537_v33 }
  0xcc   : > { %v761_v57 = vadd.f32 %v1303_v55, %v569_v53  ;;  %v762_v58 = vadd.f32 %v1304_v56, %v570_v54 }
  0xcd   : > { %v611_v26 = vpop.permute.xlu0 %610 }
  0xce   : > { %1325 = vmatprep.mubr.msk.f32.mxu1 %vm797_vm6, %v762_v58  ;;  %v224_v60 = vpop.permute.xlu1 %223  ;;  %vm653_vm3 = vcmp.eq.s32.totalorder %v611_v26, %v1793_v24  ;;  %vm654_vm4 = vcmp.eq.s32.totalorder %v611_v26, %v1801_v28 }
  0xcf   : > { %961 = vmatmul.mubr.f32.gmra.mrb[4].mxu1 %v761_v57  ;;  %vm267_vm9 = vcmp.eq.s32.totalorder %v224_v60, %v1793_v24  ;;  %vm268_vm10 = vcmp.eq.s32.totalorder %v224_v60, %v1801_v28  ;;  %v1291_v29 = vsel %vm653_vm3, 1.0, %v1537_v33  ;;  %v1292_v30 = vsel %vm654_vm4, 1.0, %v1537_v33 }
  0xd0   : > { %v1225_v3 = vsel %vm267_vm9, 1.0, %v1537_v33  ;;  %v1226_v4 = vsel %vm268_vm10, 1.0, %v1537_v33 }
  0xd1   : > { %v614_v52 = vpop.permute.xlu0 %613 }
  0xd3   : > { %v416_v62 = vpop.permute.xlu1 %415 }
  0xd4   : > { %vm459_vm11 = vcmp.eq.s32.totalorder %v416_v62, %v1793_v24  ;;  %vm460_vm12 = vcmp.eq.s32.totalorder %v416_v62, %v1801_v28 }
  0xd5   : > { %v1257_v6 = vsel %vm459_vm11, 1.0, %v1537_v33  ;;  %v1258_v7 = vsel %vm460_vm12, 1.0, %v1537_v33  ;;  %vm285_vm12 = vcmp.eq.s32.totalorder %v1826_v49, %v1793_v24 }
  0xd6   : > { %v555_v8 = vadd.f32 %v1257_v6, %v1225_v3  ;;  %v556_v9 = vadd.f32 %v1258_v7, %v1226_v4  ;;  %v1243_v42 = vsel %vm285_vm12, 1.0, %v1537_v33  ;;  %v1015_v4 = vld [vmem:[%s1833_s4 + $0x38] sm:$0xff]  ;;  %v1014_v6 = vld [vmem:[%s1833_s4 + $0x30] sm:$0xff] }
  0xd7   : > { %v440_v10 = vpop.permute.xlu1 %439  ;;  %1054 = vrot.lane.b32.xlu0 %v1015_v4, %s1538_s5  ;;  %1052 = vrot.lane.b32.xlu1 %v1014_v6, %s1538_s5 }
  0xd8   : > { %v747_v11 = vadd.f32 %v1289_v63, %v555_v8  ;;  %v748_v12 = vadd.f32 %v1290_v0, %v556_v9  ;;  %vm475_vm15 = vcmp.eq.s32.totalorder %v440_v10, %v1793_v24  ;;  %vm476_vm0 = vcmp.eq.s32.totalorder %v440_v10, %v1801_v28  ;;  %v1017_v9 = vld [vmem:[%s1833_s4 + $0x48] sm:$0xff]  ;;  %v1016_v10 = vld [vmem:[%s1833_s4 + $0x40] sm:$0xff] }
  0xd9   : > { %v1273_v15 = vsel %vm475_vm15, 1.0, %v1537_v33  ;;  %v1274_v16 = vsel %vm476_vm0, 1.0, %v1537_v33  ;;  %vm655_vm0 = vcmp.eq.s32.totalorder %v614_v52, %v1793_v24 }
  0xda   : > { %1318 = vmatprep.mubr.msk.f32.mxu0 %vm797_vm6, %v748_v12  ;;  %v571_v47 = vadd.f32 %v1273_v15, %v1241_v13  ;;  %v572_v18 = vadd.f32 %v1274_v16, %v1242_v14  ;;  %v1293_v54 = vsel %vm655_vm0, 1.0, %v1537_v33 }
  0xdb   : > { %926 = vmatmul.mubr.f32.gmra.mrb[6].mxu0 %v747_v11  ;;  %1058 = vrot.lane.b32.xlu0 %v1017_v9, %s1538_s5 }
  0xdc   : > { %v632_v17 = vpop.permute.xlu1 %631  ;;  %1056 = vrot.lane.b32.xlu1 %v1016_v10, %s1538_s5 }
  0xdd   : > { %vm667_vm1 = vcmp.eq.s32.totalorder %v632_v17, %v1793_v24  ;;  %vm668_vm2 = vcmp.eq.s32.totalorder %v632_v17, %v1801_v28  ;;  %v1019_v17 = vld [vmem:[%s1833_s4 + $0x58] sm:$0xff] }
  0xde   : > { %v1305_v19 = vsel %vm667_vm1, 1.0, %v1537_v33  ;;  %v1306_v20 = vsel %vm668_vm2, 1.0, %v1537_v33  ;;  %vm656_vm1 = vcmp.eq.s32.totalorder %v614_v52, %v1801_v28 }
  0xdf   : > { %v763_v21 = vadd.f32 %v1305_v19, %v571_v47  ;;  %v764_v22 = vadd.f32 %v1306_v20, %v572_v18  ;;  %v1294_v55 = vsel %vm656_vm1, 1.0, %v1537_v33  ;;  %v1018_v19 = vld [vmem:[%s1833_s4 + $0x50] sm:$0xff]  ;;  %1062 = vrot.lane.b32.xlu0 %v1019_v17, %s1538_s5 }
  0xe0   : > { %1060 = vrot.lane.b32.xlu1 %v1018_v19, %s1538_s5 }
  0xe1   : > { %1326 = vmatprep.mubr.msk.f32.mxu1 %vm797_vm6, %v764_v22  ;;  %v227_v23 = vpop.permute.xlu1 %226  ;;  %v1020_v22 = vld [vmem:[%s1833_s4 + $0x60] sm:$0xff] }
  0xe2   : > { %966 = vmatmul.mubr.f32.gmra.mrb[6].mxu1 %v763_v21  ;;  %vm269_vm5 = vcmp.eq.s32.totalorder %v227_v23, %v1793_v24  ;;  %vm270_vm7 = vcmp.eq.s32.totalorder %v227_v23, %v1801_v28  ;;  %v1021_v21 = vld [vmem:[%s1833_s4 + $0x68] sm:$0xff]  ;;  %v617_v23 = vpop.permute.xlu0 %616 }
  0xe3   : > { %v1227_v31 = vsel %vm269_vm5, 1.0, %v1537_v33  ;;  %v1228_v1 = vsel %vm270_vm7, 1.0, %v1537_v33  ;;  %vm287_vm7 = vcmp.eq.s32.totalorder %v1837_v51, %v1793_v24  ;;  %1066 = vrot.lane.b32.xlu0 %v1021_v21, %s1538_s5  ;;  %vm658_vm0 = vcmp.eq.s32.totalorder %v617_v23, %v1801_v28 }
  0xe4   : > { %v1245_v11 = vsel %vm287_vm7, 1.0, %v1537_v33  ;;  %1064 = vrot.lane.b32.xlu1 %v1020_v22, %s1538_s5  ;;  %vm290_vm7 = vcmp.eq.s32.totalorder %v1851_v59, %v1801_v28 }
  0xe6   : > { %v419_v27 = vpop.permute.xlu1 %418  ;;  %v620_v52 = vpop.permute.xlu0 %619 }
  0xe7   : > { %vm461_vm8 = vcmp.eq.s32.totalorder %v419_v27, %v1793_v24  ;;  %vm462_vm9 = vcmp.eq.s32.totalorder %v419_v27, %v1801_v28 }
  0xe8   : > { %v1259_v32 = vsel %vm461_vm8, 1.0, %v1537_v33  ;;  %v1260_v34 = vsel %vm462_vm9, 1.0, %v1537_v33 }
  0xe9   : > { %v557_v35 = vadd.f32 %v1259_v32, %v1227_v31  ;;  %v558_v36 = vadd.f32 %v1260_v34, %v1228_v1 }
  0xea   : > { %v443_v37 = vpop.permute.xlu1 %442 }
  0xeb   : > { %v749_v38 = vadd.f32 %v1291_v29, %v557_v35  ;;  %v750_v39 = vadd.f32 %v1292_v30, %v558_v36  ;;  %vm477_vm10 = vcmp.eq.s32.totalorder %v443_v37, %v1793_v24  ;;  %vm478_vm11 = vcmp.eq.s32.totalorder %v443_v37, %v1801_v28  ;;  %v1023_v37 = vld [vmem:[%s1833_s4 + $0x78] sm:$0xff] }
  0xec   : > { %v1275_v40 = vsel %vm477_vm10, 1.0, %v1537_v33  ;;  %v1276_v41 = vsel %vm478_vm11, 1.0, %v1537_v33  ;;  %vm288_vm10 = vcmp.eq.s32.totalorder %v1837_v51, %v1801_v28  ;;  %v1296_v35 = vsel %vm658_vm0, 1.0, %v1537_v33  ;;  %1070 = vrot.lane.b32.xlu0 %v1023_v37, %s1538_s5 }
  0xed   : > { %1319 = vmatprep.mubr.msk.f32.mxu0 %vm797_vm6, %v750_v39  ;;  %v573_v2 = vadd.f32 %v1275_v40, %v1243_v42  ;;  %v574_v45 = vadd.f32 %v1276_v41, %v1244_v43  ;;  %v1246_v12 = vsel %vm288_vm10, 1.0, %v1537_v33 }
  0xee   : > { %931 = vmatmul.mubr.f32.gmra.mrb[8].mxu0 %v749_v38  ;;  %v1022_v38 = vld [vmem:[%s1833_s4 + $0x70] sm:$0xff] }
  0xef   : > { %v635_v44 = vpop.permute.xlu1 %634  ;;  %1068 = vrot.lane.b32.xlu1 %v1022_v38, %s1538_s5 }
  0xf0   : > { %vm669_vm14 = vcmp.eq.s32.totalorder %v635_v44, %v1793_v24  ;;  %vm670_vm15 = vcmp.eq.s32.totalorder %v635_v44, %v1801_v28  ;;  %v1248_v44 = vsel %vm290_vm7, 1.0, %v1537_v33  ;;  %vm991_vm7 = vcmask 392192  }
  0xf1   : > { %v1307_v49 = vsel %vm669_vm14, 1.0, %v1537_v33  ;;  %v1308_v46 = vsel %vm670_vm15, 1.0, %v1537_v33  ;;  %vm657_vm15 = vcmp.eq.s32.totalorder %v617_v23, %v1793_v24 }
  0xf2   : > { %v765_v50 = vadd.f32 %v1307_v49, %v573_v2  ;;  %v766_v25 = vadd.f32 %v1308_v46, %v574_v45  ;;  %v1295_v34 = vsel %vm657_vm15, 1.0, %v1537_v33 }
  0xf4   : > { %1327 = vmatprep.mubr.msk.f32.mxu1 %vm797_vm6, %v766_v25  ;;  %v230_v48 = vpop.permute.xlu1 %229 }
  0xf5   : > { %971 = vmatmul.mubr.f32.gmra.mrb[8].mxu1 %v765_v50  ;;  %vm271_vm2 = vcmp.eq.s32.totalorder %v230_v48, %v1793_v24  ;;  %vm272_vm3 = vcmp.eq.s32.totalorder %v230_v48, %v1801_v28 }
  0xf6   : > { %v1229_v56 = vsel %vm271_vm2, 1.0, %v1537_v33  ;;  %v1230_v57 = vsel %vm272_vm3, 1.0, %v1537_v33 }
  0xf9   : > { %v422_v53 = vpop.permute.xlu1 %421 }
  0xfa   : > { %vm463_vm4 = vcmp.eq.s32.totalorder %v422_v53, %v1793_v24  ;;  %vm464_vm5 = vcmp.eq.s32.totalorder %v422_v53, %v1801_v28 }
  0xfb   : > { %v1261_v58 = vsel %vm463_vm4, 1.0, %v1537_v33  ;;  %v1262_v60 = vsel %vm464_vm5, 1.0, %v1537_v33  ;;  %vm289_vm5 = vcmp.eq.s32.totalorder %v1851_v59, %v1793_v24 }
  0xfc   : > { %v559_v61 = vadd.f32 %v1261_v58, %v1229_v56  ;;  %v560_v62 = vadd.f32 %v1262_v60, %v1230_v57  ;;  %v1247_v43 = vsel %vm289_vm5, 1.0, %v1537_v33 }
  0xfd   : > { %v446_v63 = vpop.permute.xlu1 %445 }
  0xfe   : > { %v751_v0 = vadd.f32 %v1293_v54, %v559_v61  ;;  %v752_v3 = vadd.f32 %v1294_v55, %v560_v62  ;;  %vm479_vm8 = vcmp.eq.s32.totalorder %v446_v63, %v1793_v24  ;;  %vm480_vm9 = vcmp.eq.s32.totalorder %v446_v63, %v1801_v28 }
  0xff   : > { %v1277_v7 = vsel %vm479_vm8, 1.0, %v1537_v33  ;;  %v1278_v8 = vsel %vm480_vm9, 1.0, %v1537_v33 }
 0x100   : > { %1320 = vmatprep.mubr.msk.f32.mxu0 %vm797_vm6, %v752_v3  ;;  %v575_v13 = vadd.f32 %v1277_v7, %v1245_v11  ;;  %v576_v15 = vadd.f32 %v1278_v8, %v1246_v12 }
 0x101   : > { %936 = vmatmul.mubr.f32.gmra.mrb[10].mxu0 %v751_v0 }
 0x102   : > { %v638_v14 = vpop.permute.xlu1 %637 }
 0x103   : > { %vm671_vm11 = vcmp.eq.s32.totalorder %v638_v14, %v1793_v24  ;;  %vm672_vm12 = vcmp.eq.s32.totalorder %v638_v14, %v1801_v28 }
 0x104   : > { %v1309_v51 = vsel %vm671_vm11, 1.0, %v1537_v33  ;;  %v1310_v16 = vsel %vm672_vm12, 1.0, %v1537_v33  ;;  %vm659_vm12 = vcmp.eq.s32.totalorder %v620_v52, %v1793_v24 }
 0x105   : > { %v767_v47 = vadd.f32 %v1309_v51, %v575_v13  ;;  %v768_v18 = vadd.f32 %v1310_v16, %v576_v15  ;;  %v1297_v61 = vsel %vm659_vm12, 1.0, %v1537_v33 }
 0x107   : > { %1328 = vmatprep.mubr.msk.f32.mxu1 %vm797_vm6, %v768_v18  ;;  %v233_v20 = vpop.permute.xlu1 %232 }
 0x108   : > { %976 = vmatmul.mubr.f32.gmra.mrb[10].mxu1 %v767_v47  ;;  %vm273_vm13 = vcmp.eq.s32.totalorder %v233_v20, %v1793_v24  ;;  %vm274_vm14 = vcmp.eq.s32.totalorder %v233_v20, %v1801_v28 }
 0x109   : > { %v1231_v27 = vsel %vm273_vm13, 1.0, %v1537_v33  ;;  %v1232_v29 = vsel %vm274_vm14, 1.0, %v1537_v33  ;;  %vm660_vm13 = vcmp.eq.s32.totalorder %v620_v52, %v1801_v28 }
 0x10a   : > { %v1298_v62 = vsel %vm660_vm13, 1.0, %v1537_v33 }
 0x10c   : > { %v425_v26 = vpop.permute.xlu1 %424 }
 0x10d   : > { %vm465_vm1 = vcmp.eq.s32.totalorder %v425_v26, %v1793_v24  ;;  %vm466_vm2 = vcmp.eq.s32.totalorder %v425_v26, %v1801_v28 }
 0x10e   : > { %v1263_v30 = vsel %vm465_vm1, 1.0, %v1537_v33  ;;  %v1264_v31 = vsel %vm466_vm2, 1.0, %v1537_v33  ;;  %vm291_vm2 = vcmp.eq.s32.totalorder %v1869_v5, %v1793_v24 }
 0x10f   : > { %v561_v1 = vadd.f32 %v1263_v30, %v1231_v27  ;;  %v562_v32 = vadd.f32 %v1264_v31, %v1232_v29  ;;  %v1249_v7 = vsel %vm291_vm2, 1.0, %v1537_v33 }
 0x110   : > { %v449_v36 = vpop.permute.xlu1 %448 }
 0x111   : > { %v754_v39 = vadd.f32 %v1296_v35, %v562_v32  ;;  %vm481_vm3 = vcmp.eq.s32.totalorder %v449_v36, %v1793_v24  ;;  %vm482_vm4 = vcmp.eq.s32.totalorder %v449_v36, %v1801_v28  ;;  %v753_v40 = vadd.f32 %v1295_v34, %v561_v1 }
 0x112   : > { %v1279_v41 = vsel %vm481_vm3, 1.0, %v1537_v33  ;;  %v1280_v42 = vsel %vm482_vm4, 1.0, %v1537_v33  ;;  %vm292_vm3 = vcmp.eq.s32.totalorder %v1869_v5, %v1801_v28 }
 0x113   : > { %1321 = vmatprep.mubr.msk.f32.mxu0 %vm797_vm6, %v754_v39  ;;  %v577_v45 = vadd.f32 %v1279_v41, %v1247_v43  ;;  %v578_v49 = vadd.f32 %v1280_v42, %v1248_v44  ;;  %v1250_v8 = vsel %vm292_vm3, 1.0, %v1537_v33 }
 0x114   : > { %941 = vmatmul.mubr.f32.gmra.mrb[12].mxu0 %v753_v40 }
 0x115   : > { %v641_v2 = vpop.permute.xlu1 %640 }
 0x116   : > { %vm673_vm8 = vcmp.eq.s32.totalorder %v641_v2, %v1793_v24  ;;  %vm674_vm9 = vcmp.eq.s32.totalorder %v641_v2, %v1801_v28 }
 0x117   : > { %v1311_v59 = vsel %vm673_vm8, 1.0, %v1537_v33  ;;  %v1312_v46 = vsel %vm674_vm9, 1.0, %v1537_v33  ;;  %vm1105_vm8 = vcmask 1047952  }
 0x118   : > { %v769_v50 = vadd.f32 %v1311_v59, %v577_v45  ;;  %v770_v25 = vadd.f32 %v1312_v46, %v578_v49 }
 0x11a   : > { %1329 = vmatprep.mubr.msk.f32.mxu1 %vm797_vm6, %v770_v25  ;;  %v236_v48 = vpop.permute.xlu1 %235 }
 0x11b   : > { %981 = vmatmul.mubr.f32.gmra.mrb[12].mxu1 %v769_v50  ;;  %vm275_vm10 = vcmp.eq.s32.totalorder %v236_v48, %v1793_v24  ;;  %vm276_vm11 = vcmp.eq.s32.totalorder %v236_v48, %v1801_v28 }
 0x11c   : > { %v1233_v54 = vsel %vm275_vm10, 1.0, %v1537_v33  ;;  %v1234_v55 = vsel %vm276_vm11, 1.0, %v1537_v33  ;;  %v1043_v17 = vpop.permute.xlu0 %1042 }
 0x11f   : > { %v428_v53 = vpop.permute.xlu1 %427 }
 0x120   : > { %vm467_vm14 = vcmp.eq.s32.totalorder %v428_v53, %v1793_v24  ;;  %vm468_vm15 = vcmp.eq.s32.totalorder %v428_v53, %v1801_v28 }
 0x121   : > { %v1265_v56 = vsel %vm467_vm14, 1.0, %v1537_v33  ;;  %v1266_v57 = vsel %vm468_vm15, 1.0, %v1537_v33 }
 0x122   : > { %v563_v58 = vadd.f32 %v1265_v56, %v1233_v54  ;;  %v564_v60 = vadd.f32 %v1266_v57, %v1234_v55 }
 0x123   : > { %v452_v63 = vpop.permute.xlu1 %451 }
 0x124   : > { %v756_v0 = vadd.f32 %v1298_v62, %v564_v60  ;;  %vm483_vm0 = vcmp.eq.s32.totalorder %v452_v63, %v1793_v24  ;;  %vm484_vm1 = vcmp.eq.s32.totalorder %v452_v63, %v1801_v28  ;;  %v755_v3 = vadd.f32 %v1297_v61, %v563_v58 }
 0x125   : > { %v1281_v4 = vsel %vm483_vm0, 1.0, %v1537_v33  ;;  %v1282_v6 = vsel %vm484_vm1, 1.0, %v1537_v33 }
 0x126   : > { %1322 = vmatprep.mubr.msk.f32.mxu0 %vm797_vm6, %v756_v0  ;;  %v579_v10 = vadd.f32 %v1281_v4, %v1249_v7  ;;  %v580_v11 = vadd.f32 %v1282_v6, %v1250_v8 }
 0x127   : > { %946 = vmatmul.mubr.f32.gmra.mrb[14].mxu0 %v755_v3 }
 0x128   : > { %v644_v9 = vpop.permute.xlu1 %643 }
 0x129   : > { %vm675_vm4 = vcmp.eq.s32.totalorder %v644_v9, %v1793_v24  ;;  %vm676_vm5 = vcmp.eq.s32.totalorder %v644_v9, %v1801_v28  ;;  %v1047_v24 = vpop.permute.xlu0 %1046 }
 0x12a   : > { %v1313_v5 = vsel %vm675_vm4, 1.0, %v1537_v33  ;;  %v1314_v12 = vsel %vm676_vm5, 1.0, %v1537_v33 }
 0x12b   : > { %v771_v13 = vadd.f32 %v1313_v5, %v579_v10  ;;  %v772_v14 = vadd.f32 %v1314_v12, %v580_v11 }
 0x12c   : > { %v1041_v15 = vpop.permute.xlu1 %1040 }
 0x12d   : > { %1330 = vmatprep.mubr.msk.f32.mxu1 %vm797_vm6, %v772_v14  ;;  %vm1088_vm6 = vcmask 408960   ;;  %v1051_v20 = vpop.permute.xlu0 %1050 }
 0x12e   : > { %986 = vmatmul.mubr.f32.gmra.mrb[14].mxu1 %v771_v13 }
 0x130   : > { %v1045_v51 = vpop.permute.xlu1 %1044 }
 0x134   : > { %v1049_v16 = vpop.permute.xlu1 %1048 }
 0x149   : > { %v2108_v47 = vpop.permute.xlu1 %1052  ;;  %v2121_v21 = vpop.permute.xlu0 %1054 }
 0x14d   : > { %v1059_v22 = vpop.permute.xlu0 %1058 }
 0x14e   : > { %v1057_v28 = vpop.permute.xlu1 %1056 }
 0x151   : > { %v1063_v39 = vpop.permute.xlu0 %1062 }
 0x152   : > { %v1061_v34 = vpop.permute.xlu1 %1060 }
 0x155   : > { %v1067_v46 = vpop.permute.xlu0 %1066 }
 0x156   : > { %v1065_v44 = vpop.permute.xlu1 %1064 }
 0x15e   : > { %v1071_v58 = vpop.permute.xlu0 %1070 }
 0x161   : > { %v1069_v53 = vpop.permute.xlu1 %1068 }
 0x17c   : > { %v952_v18 = vpop.f32.mrb[0].mxu1 }
 0x17d   : > { %1000 = vst.msk [vmem:[%s2112_s7 + $0x40] sm:$0xff] %vm991_vm7, %v952_v18  ;;  %v954_v19 = vpop.f32.mrb[1].mxu1 }
 0x17e   : > { %1097 = vst.msk [vmem:[%s2112_s7 + $0x40] sm:$0xff] %vm1088_vm6, %v1057_v28 }
 0x17f   : > { %1114 = vst.msk [vmem:[%s2112_s7 + $0x40] sm:$0xff] %vm1105_vm8, %v1537_v33 }
 0x18f   : > { %v957_v23 = vpop.f32.mrb[2].mxu1 }
 0x190   : > { %1001 = vst.msk [vmem:[%s2112_s7 + $0x48] sm:$0xff] %vm991_vm7, %v957_v23  ;;  %v959_v26 = vpop.f32.mrb[3].mxu1 }
 0x191   : > { %1098 = vst.msk [vmem:[%s2112_s7 + $0x48] sm:$0xff] %vm1088_vm6, %v1059_v22 }
 0x192   : > { %1115 = vst.msk [vmem:[%s2112_s7 + $0x48] sm:$0xff] %vm1105_vm8, %v1537_v33 }
 0x196   : > { %v912_v27 = vpop.f32.mrb[0].mxu0 }
 0x197   : > { %992 = vst.msk [vmem:[%s2112_s7] sm:$0xff] %vm991_vm7, %v912_v27  ;;  %v914_v29 = vpop.f32.mrb[1].mxu0 }
 0x198   : > { %1089 = vst.msk [vmem:[%s2112_s7] sm:$0xff] %vm1088_vm6, %v1041_v15 }
 0x199   : > { %1106 = vst.msk [vmem:[%s2112_s7] sm:$0xff] %vm1105_vm8, %v1537_v33 }
 0x19a   : > { %v917_v30 = vpop.f32.mrb[2].mxu0 }
 0x19b   : > { %993 = vst.msk [vmem:[%s2112_s7 + $0x8] sm:$0xff] %vm991_vm7, %v917_v30  ;;  %v919_v31 = vpop.f32.mrb[3].mxu0 }
 0x19c   : > { %1090 = vst.msk [vmem:[%s2112_s7 + $0x8] sm:$0xff] %vm1088_vm6, %v1043_v17 }
 0x19d   : > { %1107 = vst.msk [vmem:[%s2112_s7 + $0x8] sm:$0xff] %vm1105_vm8, %v1537_v33 }
 0x19e   : > { %v922_v1 = vpop.f32.mrb[4].mxu0 }
 0x19f   : > { %994 = vst.msk [vmem:[%s2112_s7 + $0x10] sm:$0xff] %vm991_vm7, %v922_v1  ;;  %v924_v32 = vpop.f32.mrb[5].mxu0 }
 0x1a0   : > { %1091 = vst.msk [vmem:[%s2112_s7 + $0x10] sm:$0xff] %vm1088_vm6, %v1045_v51 }
 0x1a1   : > { %1108 = vst.msk [vmem:[%s2112_s7 + $0x10] sm:$0xff] %vm1105_vm8, %v1537_v33 }
 0x1a2   : > { %v962_v35 = vpop.f32.mrb[4].mxu1 }
 0x1a3   : > { %1002 = vst.msk [vmem:[%s2112_s7 + $0x50] sm:$0xff] %vm991_vm7, %v962_v35  ;;  %v964_v36 = vpop.f32.mrb[5].mxu1 }
 0x1a4   : > { %1099 = vst.msk [vmem:[%s2112_s7 + $0x50] sm:$0xff] %vm1088_vm6, %v1061_v34 }
 0x1a5   : > { %1116 = vst.msk [vmem:[%s2112_s7 + $0x50] sm:$0xff] %vm1105_vm8, %v1537_v33 }
 0x1ae   : > { %v927_v37 = vpop.f32.mrb[6].mxu0 }
 0x1af   : > { %995 = vst.msk [vmem:[%s2112_s7 + $0x18] sm:$0xff] %vm991_vm7, %v927_v37  ;;  %v929_v38 = vpop.f32.mrb[7].mxu0 }
 0x1b0   : > { %1092 = vst.msk [vmem:[%s2112_s7 + $0x18] sm:$0xff] %vm1088_vm6, %v1047_v24 }
 0x1b1   : > { %1109 = vst.msk [vmem:[%s2112_s7 + $0x18] sm:$0xff] %vm1105_vm8, %v1537_v33 }
 0x1b5   : > { %v967_v40 = vpop.f32.mrb[6].mxu1 }
 0x1b6   : > { %1003 = vst.msk [vmem:[%s2112_s7 + $0x58] sm:$0xff] %vm991_vm7, %v967_v40  ;;  %v969_v41 = vpop.f32.mrb[7].mxu1 }
 0x1b7   : > { %1100 = vst.msk [vmem:[%s2112_s7 + $0x58] sm:$0xff] %vm1088_vm6, %v1063_v39 }
 0x1b8   : > { %1117 = vst.msk [vmem:[%s2112_s7 + $0x58] sm:$0xff] %vm1105_vm8, %v1537_v33 }
 0x1c1   : > { %v932_v42 = vpop.f32.mrb[8].mxu0 }
 0x1c2   : > { %996 = vst.msk [vmem:[%s2112_s7 + $0x20] sm:$0xff] %vm991_vm7, %v932_v42  ;;  %v934_v43 = vpop.f32.mrb[9].mxu0 }
 0x1c3   : > { %1093 = vst.msk [vmem:[%s2112_s7 + $0x20] sm:$0xff] %vm1088_vm6, %v1049_v16 }
 0x1c4   : > { %1110 = vst.msk [vmem:[%s2112_s7 + $0x20] sm:$0xff] %vm1105_vm8, %v1537_v33 }
 0x1c8   : > { %v972_v2 = vpop.f32.mrb[8].mxu1 }
 0x1c9   : > { %1004 = vst.msk [vmem:[%s2112_s7 + $0x60] sm:$0xff] %vm991_vm7, %v972_v2  ;;  %v974_v45 = vpop.f32.mrb[9].mxu1 }
 0x1ca   : > { %1101 = vst.msk [vmem:[%s2112_s7 + $0x60] sm:$0xff] %vm1088_vm6, %v1065_v44 }
 0x1cb   : > { %1118 = vst.msk [vmem:[%s2112_s7 + $0x60] sm:$0xff] %vm1105_vm8, %v1537_v33 }
 0x1d4   : > { %v937_v49 = vpop.f32.mrb[10].mxu0 }
 0x1d5   : > { %997 = vst.msk [vmem:[%s2112_s7 + $0x28] sm:$0xff] %vm991_vm7, %v937_v49  ;;  %v939_v59 = vpop.f32.mrb[11].mxu0 }
 0x1d6   : > { %1094 = vst.msk [vmem:[%s2112_s7 + $0x28] sm:$0xff] %vm1088_vm6, %v1051_v20 }
 0x1d7   : > { %1111 = vst.msk [vmem:[%s2112_s7 + $0x28] sm:$0xff] %vm1105_vm8, %v1537_v33 }
 0x1db   : > { %v977_v50 = vpop.f32.mrb[10].mxu1 }
 0x1dc   : > { %1005 = vst.msk [vmem:[%s2112_s7 + $0x68] sm:$0xff] %vm991_vm7, %v977_v50  ;;  %v979_v25 = vpop.f32.mrb[11].mxu1 }
 0x1dd   : > { %1102 = vst.msk [vmem:[%s2112_s7 + $0x68] sm:$0xff] %vm1088_vm6, %v1067_v46 }
 0x1de   : > { %1119 = vst.msk [vmem:[%s2112_s7 + $0x68] sm:$0xff] %vm1105_vm8, %v1537_v33 }
 0x1e7   : > { %v942_v48 = vpop.f32.mrb[12].mxu0 }
 0x1e8   : > { %998 = vst.msk [vmem:[%s2112_s7 + $0x30] sm:$0xff] %vm991_vm7, %v942_v48  ;;  %v944_v52 = vpop.f32.mrb[13].mxu0 }
 0x1e9   : > { %1095 = vst.msk [vmem:[%s2112_s7 + $0x30] sm:$0xff] %vm1088_vm6, %v2108_v47 }
 0x1ea   : > { %1112 = vst.msk [vmem:[%s2112_s7 + $0x30] sm:$0xff] %vm1105_vm8, %v1537_v33 }
 0x1ee   : > { %v982_v54 = vpop.f32.mrb[12].mxu1 }
 0x1ef   : > { %1006 = vst.msk [vmem:[%s2112_s7 + $0x70] sm:$0xff] %vm991_vm7, %v982_v54  ;;  %v984_v55 = vpop.f32.mrb[13].mxu1 }
 0x1f0   : > { %1103 = vst.msk [vmem:[%s2112_s7 + $0x70] sm:$0xff] %vm1088_vm6, %v1069_v53 }
 0x1f1   : > { %1120 = vst.msk [vmem:[%s2112_s7 + $0x70] sm:$0xff] %vm1105_vm8, %v1537_v33 }
 0x1fa   : > { %v947_v56 = vpop.f32.mrb[14].mxu0 }
 0x1fb   : > { %999 = vst.msk [vmem:[%s2112_s7 + $0x38] sm:$0xff] %vm991_vm7, %v947_v56  ;;  %v949_v57 = vpop.f32.mrb[15].mxu0 }
 0x1fc   : > { %1096 = vst.msk [vmem:[%s2112_s7 + $0x38] sm:$0xff] %vm1088_vm6, %v2121_v21 }
 0x1fd   : > { %1113 = vst.msk [vmem:[%s2112_s7 + $0x38] sm:$0xff] %vm1105_vm8, %v1537_v33 }
 0x201   : > { %v987_v60 = vpop.f32.mrb[14].mxu1 }
 0x202   : > { %1007 = vst.msk [vmem:[%s2112_s7 + $0x78] sm:$0xff] %vm991_vm7, %v987_v60  ;;  %v989_v61 = vpop.f32.mrb[15].mxu1 }
 0x203   : > { %1104 = vst.msk [vmem:[%s2112_s7 + $0x78] sm:$0xff] %vm1088_vm6, %v1071_v58 }
 0x204   : > { %1121 = vst.msk [vmem:[%s2112_s7 + $0x78] sm:$0xff] %vm1105_vm8, %v1537_v33 }
 0x205   : > { %1482 = shalt.err (!%p1479_p3)
}
 0x206   : > { %s1483_s28 = scalar_lea.hbm %s2228_s17, 2048  ;;  %s1487_s30 = scalar_lea.hbm %s2285_s3, 4096 }
 0x207   : > { %p1484_p4 = scmp.ne.s32.totalorder %s2228_s17, %s1483_s28  ;;  %p1488_p9 = scmp.lt.u32.totalorder %s2228_s17, %s2285_s3 }
 0x208   : > { %p1489_p10 = scmp.lt.u32.totalorder %s1487_s30, %s1483_s28  ;;  %p1491_p12 = scmp.lt.u32.totalorder %s1483_s28, %s2228_s17 }
 0x209   : > { %p1485_p7 = pnand %p1484_p4, %p1600_p5 }
 0x20a   : > { %p1490_p11 = por %p1489_p10, %p1488_p9 }
 0x20b   : > { %p1486_p8 = pneg %p1485_p7 }
 0x20c   : > { %p1492_p13 = por %p1491_p12, %p1490_p11 }
 0x20e   : > { %p1493_p0 = pnand %p1492_p13, %p1486_p8 }
 0x210   : > { %1496 = shalt.err (!%p1493_p0)
}
 0x211   : > { %s1540_s24 = smov 128   ;;  %s1541_s6 = smov 8  }
 0x212   : > { %1397 = dma.vmem_to_hbm [thread:$0]  (%p1600_p5), %s2230_s9, 2048, %s2228_s17, %s2241_s16, %s1540_s24, %s1540_s24, %s1541_s6  }
 0x213 PF: > { %p1403_p1 = scmp.ge.s32.totalorder %s1531_s15, 2  ;;  %s1151_s7 = sand.u32 1, %s1519_s12  }
 0x214   : > { %s1152_s8 = scalar_lea.sflag [#allocation3], %s1151_s7 }
 0x215   : > { %p1400_p2 = pnand %p1403_p1, %p1604_p6 }
 0x217   : > { %1514 = dma.done.wait (!%p1400_p2), %s1152_s8, 2048  }
 0x218   : > { %1516 = vsyncadd (!%p1400_p2), %s1152_s8, 4294965248  ;;  %p13_p3 = scmp.ge.s32.totalorder %s1587_s18, 4   ;;  %s2288_s12 = smov %s1523_s13 }
 0x219   : > { %s2289_s13 = smov %s1527_s14  ;;  %s2290_s14 = smov %s1598_s21 }
 0x21a   : > { %s2291_s15 = smov %s1587_s18  ;;  %15 = sbr.rel (!%p13_p3) target bundleno = 3 (0x3), region = 70 }
 0x221   :  { %1157 = vsyncpa [#allocation3], 1 }
 0x222   :  { %1159 = vsyncpa [#allocation3 + $0x1], 1 }

</bundles_post_ra>
